<compile_context>
chip_gen: v7x
topology: tpu7x:2x2x1
jax: 0.10.0
libtpu: 0.0.40
codegen_flags: <defaults>
</compile_context>

<pallas_src>
import functools
import math

import jax
import jax.numpy as jnp
from jax.experimental import pallas as pl
from jax.experimental.pallas import tpu as pltpu


# ----------------------------------------------------------------------------
# In-kernel helpers (operate on jnp values already loaded from refs)
# ----------------------------------------------------------------------------

def _gelu(x):
    # TODO(synk): PyTorch F.gelu defaults to exact erf GELU; the tanh
    # approximation is used since erf lowering is not guaranteed in Mosaic.
    c = math.sqrt(2.0 / math.pi)
    return 0.5 * x * (1.0 + jnp.tanh(c * (x + 0.044715 * x * x * x)))


def _ln(x, g, b, eps=1e-5):
    mu = jnp.mean(x, axis=-1, keepdims=True)
    var = jnp.mean((x - mu) * (x - mu), axis=-1, keepdims=True)
    return (x - mu) * jax.lax.rsqrt(var + eps) * g + b


def _mha_block(q_in, k_in, v_in, wqkv, bqkv, wo, bo, bias_row, nhead, need_probs):
    """Multi-head attention on a single batch element, fused QKV weights.

    q_in: [Lq, D]; k_in/v_in: [Lk, D]; wqkv: [D, 3D]; bqkv/bo: [1, 3D]/[1, D];
    bias_row: [1, Lk] additive key-padding bias (0 or -1e9).
    Returns (out [Lq, D], head-mean probs [Lq, Lk] or None).
    """
    _, D = q_in.shape
    Dh = D // nhead
    scale = 1.0 / math.sqrt(Dh)

    q = jnp.dot(q_in, wqkv[:, :D], preferred_element_type=jnp.float32) + bqkv[:, :D]
    k = jnp.dot(k_in, wqkv[:, D:2 * D], preferred_element_type=jnp.float32) + bqkv[:, D:2 * D]
    v = jnp.dot(v_in, wqkv[:, 2 * D:], preferred_element_type=jnp.float32) + bqkv[:, 2 * D:]

    head_outs = []
    probs_sum = None
    for h in range(nhead):                          # static unroll, nhead is small
        sl = slice(h * Dh, (h + 1) * Dh)
        s = jax.lax.dot_general(q[:, sl], k[:, sl], (((1,), (1,)), ((), ())),
                                preferred_element_type=jnp.float32)
        s = s * scale + bias_row                    # broadcast [1, Lk] over rows
        m = jnp.max(s, axis=-1, keepdims=True)
        e = jnp.exp(s - m)
        denom = jnp.sum(e, axis=-1, keepdims=True)
        p = e * pl.reciprocal(denom, approx=True)   # divide -> EUP reciprocal
        head_outs.append(jnp.dot(p, v[:, sl], preferred_element_type=jnp.float32))
        if need_probs:
            probs_sum = p if probs_sum is None else probs_sum + p

    out = jnp.concatenate(head_outs, axis=-1)       # [Lq, D]
    out = jnp.dot(out, wo, preferred_element_type=jnp.float32) + bo
    probs_mean = probs_sum * (1.0 / nhead) if need_probs else None
    return out, probs_mean


# ----------------------------------------------------------------------------
# Pallas kernels
# ----------------------------------------------------------------------------

def _decoder_layer_kernel(tgt_ref, mem_ref, pos_ref, qpe_ref, tbias_ref, mbias_ref,
                          rph_w1_ref, rph_b1_ref, rph_w2_ref, rph_b2_ref,
                          sa_wqkv_ref, sa_bqkv_ref, sa_wo_ref, sa_bo_ref,
                          ca_wqkv_ref, ca_bqkv_ref, ca_wo_ref, ca_bo_ref,
                          ffn_w1_ref, ffn_b1_ref, ffn_w2_ref, ffn_b2_ref,
                          n1_g_ref, n1_b_ref, n2_g_ref, n2_b_ref, n3_g_ref, n3_b_ref,
                          *out_refs, nhead, need_attn):
    # TODO(synk): the real EdgeCape GraphTransformerDecoderLayer (graph
    # attention over `adj`) is an injected dependency not defined in this
    # module; a DETR-style (self-attn + cross-attn + FFN, post-norm) layer is
    # used as a stand-in with the same call/return signature.
    o_tgt_ref = out_refs[0]

    x = tgt_ref[0]            # [NQ, D]
    mem = mem_ref[0]          # [HW, D]
    posm = pos_ref[0]         # [HW, D]
    qpe_raw = qpe_ref[0]      # [NQ, D]
    tbias = tbias_ref[0]      # [1, NQ]
    mbias = mbias_ref[0]      # [1, HW]

    # ref_point_head: MLP(d_model, d_model, d_model, 2), gelu on hidden layer.
    hq = _gelu(jnp.dot(qpe_raw, rph_w1_ref[...],
                       preferred_element_type=jnp.float32) + rph_b1_ref[...])
    qpe = jnp.dot(hq, rph_w2_ref[...],
                  preferred_element_type=jnp.float32) + rph_b2_ref[...]

    # Self-attention (q = k = tgt + query_pos_embed, v = tgt), post-norm.
    sa_out, _ = _mha_block(x + qpe, x + qpe, x,
                           sa_wqkv_ref[...], sa_bqkv_ref[...],
                           sa_wo_ref[...], sa_bo_ref[...],
                           tbias, nhead, need_probs=False)
    x = _ln(x + sa_out, n1_g_ref[...], n1_b_ref[...])

    # Cross-attention (q = tgt + query_pos_embed, k = memory + pos, v = memory).
    ca_out, probs = _mha_block(x + qpe, mem + posm, mem,
                               ca_wqkv_ref[...], ca_bqkv_ref[...],
                               ca_wo_ref[...], ca_bo_ref[...],
                               mbias, nhead, need_probs=need_attn)
    x = _ln(x + ca_out, n2_g_ref[...], n2_b_ref[...])

    # FFN.
    hf = _gelu(jnp.dot(x, ffn_w1_ref[...],
                       preferred_element_type=jnp.float32) + ffn_b1_ref[...])
    y = jnp.dot(hf, ffn_w2_ref[...],
                preferred_element_type=jnp.float32) + ffn_b2_ref[...]
    x = _ln(x + y, n3_g_ref[...], n3_b_ref[...])

    o_tgt_ref[0] = x
    if need_attn:
        out_refs[1][0] = probs


def _kpt_update_kernel(x_ref, bi_ref, w1_ref, b1_ref, w2_ref, b2_ref, w3_ref, b3_ref,
                       o_ref, *, eps):
    # kpt_branch MLP(D, D, 2, 3) fused with TransformerDecoder.update
    # (inverse_sigmoid(clamp(bi)) + delta, then sigmoid).
    x = x_ref[...]
    h = _gelu(jnp.dot(x, w1_ref[...], preferred_element_type=jnp.float32) + b1_ref[...])
    h = _gelu(jnp.dot(h, w2_ref[...], preferred_element_type=jnp.float32) + b2_ref[...])
    delta = jnp.dot(h, w3_ref[...], preferred_element_type=jnp.float32) + b3_ref[...]

    c = jnp.clip(bi_ref[...], 0.0, 1.0)
    x1 = jnp.maximum(c, eps)
    x2 = jnp.maximum(1.0 - c, eps)
    o_ref[...] = jax.nn.sigmoid(jnp.log(x1 / x2) + delta)


def _layernorm_kernel(x_ref, g_ref, b_ref, o_ref, *, eps):
    o_ref[...] = _ln(x_ref[...], g_ref[...], b_ref[...], eps=eps)


# ----------------------------------------------------------------------------
# pallas_call wrappers
# ----------------------------------------------------------------------------

def decoder_layer_pallas(lp, rph, tgt_b, mem_b, pos_b, qpe_b, tbias, mbias,
                         *, nhead, need_attn):
    B, NQ, D = tgt_b.shape
    HW = mem_b.shape[1]

    weight_arrays = [
        rph["w1"], rph["b1"], rph["w2"], rph["b2"],
        lp["sa_wqkv"], lp["sa_bqkv"], lp["sa_wo"], lp["sa_bo"],
        lp["ca_wqkv"], lp["ca_bqkv"], lp["ca_wo"], lp["ca_bo"],
        lp["ffn_w1"], lp["ffn_b1"], lp["ffn_w2"], lp["ffn_b2"],
        lp["n1_g"], lp["n1_b"], lp["n2_g"], lp["n2_b"], lp["n3_g"], lp["n3_b"],
    ]

    def _w_spec(a):
        return pl.BlockSpec(a.shape, lambda b: (0, 0))

    in_specs = [
        pl.BlockSpec((1, NQ, D), lambda b: (b, 0, 0)),   # tgt
        pl.BlockSpec((1, HW, D), lambda b: (b, 0, 0)),   # memory
        pl.BlockSpec((1, HW, D), lambda b: (b, 0, 0)),   # pos
        pl.BlockSpec((1, NQ, D), lambda b: (b, 0, 0)),   # raw query_pos_embed
        pl.BlockSpec((1, 1, NQ), lambda b: (b, 0, 0)),   # tgt key-padding bias
        pl.BlockSpec((1, 1, HW), lambda b: (b, 0, 0)),   # memory key-padding bias
    ] + [_w_spec(a) for a in weight_arrays]

    out_shape = [jax.ShapeDtypeStruct((B, NQ, D), jnp.float32)]
    out_specs = [pl.BlockSpec((1, NQ, D), lambda b: (b, 0, 0))]
    if need_attn:
        out_shape.append(jax.ShapeDtypeStruct((B, NQ, HW), jnp.float32))
        out_specs.append(pl.BlockSpec((1, NQ, HW), lambda b: (b, 0, 0)))

    outs = pl.pallas_call(
        functools.partial(_decoder_layer_kernel, nhead=nhead, need_attn=need_attn),
        grid=(B,),
        in_specs=in_specs,
        out_specs=out_specs,
        out_shape=out_shape,
        compiler_params=pltpu.CompilerParams(dimension_semantics=("parallel",)),
    )(tgt_b, mem_b, pos_b, qpe_b, tbias, mbias, *weight_arrays)

    if need_attn:
        return outs[0], outs[1]
    return outs[0], None


def kpt_update_pallas(kp, x_bnd, bi, eps=0.001):
    B, NQ, D = x_bnd.shape
    M = B * NQ
    out = pl.pallas_call(
        functools.partial(_kpt_update_kernel, eps=eps),
        grid=(1,),
        in_specs=[
            pl.BlockSpec((M, D), lambda i: (0, 0)),
            pl.BlockSpec((M, 2), lambda i: (0, 0)),
            pl.BlockSpec((D, D), lambda i: (0, 0)),
            pl.BlockSpec((1, D), lambda i: (0, 0)),
            pl.BlockSpec((D, D), lambda i: (0, 0)),
            pl.BlockSpec((1, D), lambda i: (0, 0)),
            pl.BlockSpec((D, 2), lambda i: (0, 0)),
            pl.BlockSpec((1, 2), lambda i: (0, 0)),
        ],
        out_specs=pl.BlockSpec((M, 2), lambda i: (0, 0)),
        out_shape=jax.ShapeDtypeStruct((M, 2), jnp.float32),
    )(x_bnd.reshape(M, D), bi.reshape(M, 2),
      kp["w1"], kp["b1"], kp["w2"], kp["b2"], kp["w3"], kp["b3"])
    return out.reshape(B, NQ, 2)


def layernorm_pallas(p, x, eps=1e-5):
    shape = x.shape
    x2 = x.reshape(-1, shape[-1])
    M, D = x2.shape
    out = pl.pallas_call(
        functools.partial(_layernorm_kernel, eps=eps),
        grid=(1,),
        in_specs=[pl.BlockSpec((M, D), lambda i: (0, 0)),
                  pl.BlockSpec((1, D), lambda i: (0, 0)),
                  pl.BlockSpec((1, D), lambda i: (0, 0))],
        out_specs=pl.BlockSpec((M, D), lambda i: (0, 0)),
        out_shape=jax.ShapeDtypeStruct((M, D), jnp.float32),
    )(x2, p["g"], p["b"])
    return out.reshape(shape)


# ----------------------------------------------------------------------------
# JAX glue: sine position embedding stand-in
# ----------------------------------------------------------------------------

def sine_pos_embed_from_coords(coords, d_model, temperature=10000.0):
    """position_embedding.forward_coordinates stand-in: [B,NQ,2] -> [B,NQ,D]."""
    B, NQ, _ = coords.shape
    scale = 2.0 * math.pi
    num_feats = d_model // 2
    dim_t = temperature ** (2.0 * (jnp.arange(num_feats) // 2) / num_feats)
    x = coords[..., 0] * scale
    y = coords[..., 1] * scale
    pos_x = x[..., None] / dim_t
    pos_y = y[..., None] / dim_t
    pos_x = jnp.stack([jnp.sin(pos_x[..., 0::2]), jnp.cos(pos_x[..., 1::2])],
                      axis=-1).reshape(B, NQ, -1)
    pos_y = jnp.stack([jnp.sin(pos_y[..., 0::2]), jnp.cos(pos_y[..., 1::2])],
                      axis=-1).reshape(B, NQ, -1)
    return jnp.concatenate([pos_y, pos_x], axis=-1)


# ----------------------------------------------------------------------------
# TransformerDecoder forward (jit'ed)
# ----------------------------------------------------------------------------

@functools.partial(jax.jit, static_argnames=("nhead", "return_attn_map"))
def transformer_decoder_forward(params, support_feat, query_feat,
                                tgt_key_padding_mask, memory_key_padding_mask,
                                pos, query_pos, initial_proposals, adj,
                                nhead, return_attn_map=False):
    d_model = support_feat.shape[-1]
    num_layers = len(params["layers"])

    # Batch-first layouts for the fused per-batch-element layer kernel.
    tgt_b = jnp.transpose(support_feat, (1, 0, 2))   # [B, NQ, D]
    mem_b = jnp.transpose(query_feat, (1, 0, 2))     # [B, HW, D]
    pos_b = jnp.transpose(pos, (1, 0, 2))            # [B, HW, D]
    B, NQ, _ = tgt_b.shape
    HW = mem_b.shape[1]

    # tgt_key_padding_mask_remove_all_true: fully-padded rows get entry 0
    # un-masked so the softmax never sees an all-masked row.
    all_true = jnp.sum(jnp.logical_not(tgt_key_padding_mask), axis=-1) == 0
    tkpm_fixed = tgt_key_padding_mask.at[:, 0].set(
        jnp.where(all_true, False, tgt_key_padding_mask[:, 0]))

    NEG = jnp.float32(-1e9)
    tbias = jnp.where(tkpm_fixed, NEG, jnp.float32(0.0)).reshape(B, 1, NQ)
    mbias = jnp.where(memory_key_padding_mask, NEG, jnp.float32(0.0)).reshape(B, 1, HW)

    bi = initial_proposals
    query_points = [initial_proposals]
    attn_maps = []
    adjs = []                  # return_intermediate=False -> stays empty
    adj_gt = adj

    x_b = tgt_b
    for layer_idx in range(num_layers):
        if layer_idx == 0:
            qpe_b = query_pos                                     # [B, NQ, D]
        else:
            qpe_b = sine_pos_embed_from_coords(bi, d_model)       # [B, NQ, D]

        x_b, cross_attn = decoder_layer_pallas(
            params["layers"][layer_idx], params["ref_point_head"],
            x_b, mem_b, pos_b, qpe_b, tbias, mbias,
            nhead=nhead, need_attn=return_attn_map)

        if return_attn_map:
            attn_maps.append(cross_attn)                          # [B, NQ, HW]

        bi = kpt_update_pallas(params["kpt_branch"][layer_idx], x_b, bi)
        query_points.append(bi)

    final_b = layernorm_pallas(params["final_norm"], x_b)         # [B, NQ, D]
    refined = jnp.transpose(final_b, (1, 0, 2))                   # [NQ, B, D]
    return refined[None], query_points, [adjs, adj_gt], attn_maps


# ----------------------------------------------------------------------------
# Deterministic parameter init (synthetic weights, no checkpoint)
# ----------------------------------------------------------------------------

def init_params(key, d_model, num_layers, dim_ffn):
    keys = iter(jax.random.split(key, 256))

    def w(fan_in, fan_out):
        return jax.random.normal(next(keys), (fan_in, fan_out), jnp.float32) * 0.02

    def b(n):
        return jnp.zeros((1, n), jnp.float32)

    def ones(n):
        return jnp.ones((1, n), jnp.float32)

    def layer():
        return {
            "sa_wqkv": w(d_model, 3 * d_model), "sa_bqkv": b(3 * d_model),
            "sa_wo": w(d_model, d_model), "sa_bo": b(d_model),
            "ca_wqkv": w(d_model, 3 * d_model), "ca_bqkv": b(3 * d_model),
            "ca_wo": w(d_model, d_model), "ca_bo": b(d_model),
            "ffn_w1": w(d_model, dim_ffn), "ffn_b1": b(dim_ffn),
            "ffn_w2": w(dim_ffn, d_model), "ffn_b2": b(d_model),
            "n1_g": ones(d_model), "n1_b": b(d_model),
            "n2_g": ones(d_model), "n2_b": b(d_model),
            "n3_g": ones(d_model), "n3_b": b(d_model),
        }

    def kpt():
        return {"w1": w(d_model, d_model), "b1": b(d_model),
                "w2": w(d_model, d_model), "b2": b(d_model),
                "w3": w(d_model, 2), "b3": b(2)}

    return {
        # MLP(d_model, d_model, d_model, 2)
        "ref_point_head": {"w1": w(d_model, d_model), "b1": b(d_model),
                           "w2": w(d_model, d_model), "b2": b(d_model)},
        "layers": [layer() for _ in range(num_layers)],
        # kpt_branch[i] = MLP(d_model, d_model, 2, 3)
        "kpt_branch": [kpt() for _ in range(num_layers)],
        "final_norm": {"g": ones(d_model), "b": b(d_model)},
    }


# ----------------------------------------------------------------------------
# Main
# ----------------------------------------------------------------------------

if __name__ == "__main__":
    B, NQ, HW, D = 2, 8, 16, 32
    NHEAD, NUM_LAYERS, DIM_FFN = 4, 2, 64

    root = jax.random.PRNGKey(0)
    k_par, k_sf, k_qf, k_pos, k_qp, k_ip, k_adj = jax.random.split(root, 7)

    params = init_params(k_par, D, NUM_LAYERS, DIM_FFN)

    support_feat = jax.random.normal(k_sf, (NQ, B, D), jnp.float32)
    query_feat = jax.random.normal(k_qf, (HW, B, D), jnp.float32)
    pos = jax.random.normal(k_pos, (HW, B, D), jnp.float32)
    query_pos = jax.random.normal(k_qp, (B, NQ, D), jnp.float32)
    initial_proposals = jax.random.uniform(k_ip, (B, NQ, 2), jnp.float32)
    adj = jax.random.uniform(k_adj, (B, NQ, NQ), jnp.float32)

    # batch 0: no padding; batch 1: fully padded -> exercises the
    # "remove_all_true" fixup in the decoder forward.
    tgt_key_padding_mask = jnp.stack(
        [jnp.zeros((NQ,), jnp.bool_), jnp.ones((NQ,), jnp.bool_)], axis=0)
    memory_key_padding_mask = jnp.zeros((B, HW), jnp.bool_)

    out, query_points, adjs_out, attn_maps = transformer_decoder_forward(
        params, support_feat, query_feat, tgt_key_padding_mask,
        memory_key_padding_mask, pos, query_pos, initial_proposals, adj,
        nhead=NHEAD, return_attn_map=True)

    jax.block_until_ready(out)
    jax.block_until_ready(query_points[-1])

    assert out.shape == (1, NQ, B, D)
    assert len(query_points) == NUM_LAYERS + 1
    assert query_points[-1].shape == (B, NQ, 2)
    assert len(attn_maps) == NUM_LAYERS and attn_maps[0].shape == (B, NQ, HW)
    assert jnp.all(jnp.isfinite(out))
    print("KERNEL_OK")
</pallas_src>

<mosaic_0001>
module attributes {stable_mosaic.version = 11 : i64} {
  func.func @_kpt_update_kernel(%arg0: i32, %arg1: memref<16x32xf32, #tpu.memory_space<vmem>>, %arg2: memref<16x2xf32, #tpu.memory_space<vmem>>, %arg3: memref<32x32xf32, #tpu.memory_space<vmem>>, %arg4: memref<1x32xf32, #tpu.memory_space<vmem>>, %arg5: memref<32x32xf32, #tpu.memory_space<vmem>>, %arg6: memref<1x32xf32, #tpu.memory_space<vmem>>, %arg7: memref<32x2xf32, #tpu.memory_space<vmem>>, %arg8: memref<1x2xf32, #tpu.memory_space<vmem>>, %arg9: memref<16x2xf32, #tpu.memory_space<vmem>>) attributes {dimension_semantics = [#tpu.dimension_semantics<arbitrary>], iteration_bounds = array<i64: 1>, scalar_prefetch = 0 : i64, scratch_operands = 0 : i64, tpu.core_type = #tpu.core_type<tc>, window_params = [{pipeline_mode = #tpu.pipeline_mode<synchronous>, transform_indices = @transform_0, window_bounds = array<i64: 16, 32>}, {pipeline_mode = #tpu.pipeline_mode<synchronous>, transform_indices = @transform_1, window_bounds = array<i64: 16, 2>}, {pipeline_mode = #tpu.pipeline_mode<synchronous>, transform_indices = @transform_2, window_bounds = array<i64: 32, 32>}, {pipeline_mode = #tpu.pipeline_mode<synchronous>, transform_indices = @transform_3, window_bounds = array<i64: 1, 32>}, {pipeline_mode = #tpu.pipeline_mode<synchronous>, transform_indices = @transform_4, window_bounds = array<i64: 32, 32>}, {pipeline_mode = #tpu.pipeline_mode<synchronous>, transform_indices = @transform_5, window_bounds = array<i64: 1, 32>}, {pipeline_mode = #tpu.pipeline_mode<synchronous>, transform_indices = @transform_6, window_bounds = array<i64: 32, 2>}, {pipeline_mode = #tpu.pipeline_mode<synchronous>, transform_indices = @transform_7, window_bounds = array<i64: 1, 2>}, {pipeline_mode = #tpu.pipeline_mode<synchronous>, transform_indices = @transform_8, window_bounds = array<i64: 16, 2>}]} {
    %c0 = arith.constant 0 : index
    %c0_0 = arith.constant 0 : index
    %0 = vector.load %arg1[%c0, %c0_0] : memref<16x32xf32, #tpu.memory_space<vmem>>, vector<16x32xf32>
    %c0_1 = arith.constant 0 : index
    %c0_2 = arith.constant 0 : index
    %1 = vector.load %arg3[%c0_1, %c0_2] : memref<32x32xf32, #tpu.memory_space<vmem>>, vector<32x32xf32>
    %cst = arith.constant dense<0.000000e+00> : vector<16x32xf32>
    %2 = tpu.matmul %0, %1, %cst {dimension_numbers = #tpu.dot_dimension_numbers<[1], [0], [0], [1], [0, 0, 1, 1], [], []>} : vector<16x32xf32>, vector<32x32xf32>, vector<16x32xf32> -> vector<16x32xf32>
    %c0_3 = arith.constant 0 : index
    %c0_4 = arith.constant 0 : index
    %3 = vector.load %arg4[%c0_3, %c0_4] : memref<1x32xf32, #tpu.memory_space<vmem>>, vector<1x32xf32>
    %4 = vector.broadcast %3 : vector<1x32xf32> to vector<16x32xf32>
    %5 = arith.addf %2, %4 : vector<16x32xf32>
    %cst_5 = arith.constant 5.000000e-01 : f32
    %6 = vector.broadcast %cst_5 : f32 to vector<16x32xf32>
    %7 = arith.mulf %6, %5 : vector<16x32xf32>
    %cst_6 = arith.constant 4.471500e-02 : f32
    %8 = vector.broadcast %cst_6 : f32 to vector<16x32xf32>
    %9 = arith.mulf %8, %5 : vector<16x32xf32>
    %10 = arith.mulf %9, %5 : vector<16x32xf32>
    %11 = arith.mulf %10, %5 : vector<16x32xf32>
    %12 = arith.addf %5, %11 : vector<16x32xf32>
    %cst_7 = arith.constant 0.797884583 : f32
    %13 = vector.broadcast %cst_7 : f32 to vector<16x32xf32>
    %14 = arith.mulf %13, %12 : vector<16x32xf32>
    %15 = math.tanh %14 : vector<16x32xf32>
    %cst_8 = arith.constant 1.000000e+00 : f32
    %16 = vector.broadcast %cst_8 : f32 to vector<16x32xf32>
    %17 = arith.addf %16, %15 : vector<16x32xf32>
    %18 = arith.mulf %7, %17 : vector<16x32xf32>
    %c0_9 = arith.constant 0 : index
    %c0_10 = arith.constant 0 : index
    %19 = vector.load %arg5[%c0_9, %c0_10] : memref<32x32xf32, #tpu.memory_space<vmem>>, vector<32x32xf32>
    %cst_11 = arith.constant dense<0.000000e+00> : vector<16x32xf32>
    %20 = tpu.matmul %18, %19, %cst_11 {dimension_numbers = #tpu.dot_dimension_numbers<[1], [0], [0], [1], [0, 0, 1, 1], [], []>} : vector<16x32xf32>, vector<32x32xf32>, vector<16x32xf32> -> vector<16x32xf32>
    %c0_12 = arith.constant 0 : index
    %c0_13 = arith.constant 0 : index
    %21 = vector.load %arg6[%c0_12, %c0_13] : memref<1x32xf32, #tpu.memory_space<vmem>>, vector<1x32xf32>
    %22 = vector.broadcast %21 : vector<1x32xf32> to vector<16x32xf32>
    %23 = arith.addf %20, %22 : vector<16x32xf32>
    %cst_14 = arith.constant 5.000000e-01 : f32
    %24 = vector.broadcast %cst_14 : f32 to vector<16x32xf32>
    %25 = arith.mulf %24, %23 : vector<16x32xf32>
    %cst_15 = arith.constant 4.471500e-02 : f32
    %26 = vector.broadcast %cst_15 : f32 to vector<16x32xf32>
    %27 = arith.mulf %26, %23 : vector<16x32xf32>
    %28 = arith.mulf %27, %23 : vector<16x32xf32>
    %29 = arith.mulf %28, %23 : vector<16x32xf32>
    %30 = arith.addf %23, %29 : vector<16x32xf32>
    %cst_16 = arith.constant 0.797884583 : f32
    %31 = vector.broadcast %cst_16 : f32 to vector<16x32xf32>
    %32 = arith.mulf %31, %30 : vector<16x32xf32>
    %33 = math.tanh %32 : vector<16x32xf32>
    %cst_17 = arith.constant 1.000000e+00 : f32
    %34 = vector.broadcast %cst_17 : f32 to vector<16x32xf32>
    %35 = arith.addf %34, %33 : vector<16x32xf32>
    %36 = arith.mulf %25, %35 : vector<16x32xf32>
    %c0_18 = arith.constant 0 : index
    %c0_19 = arith.constant 0 : index
    %37 = vector.load %arg7[%c0_18, %c0_19] : memref<32x2xf32, #tpu.memory_space<vmem>>, vector<32x2xf32>
    %cst_20 = arith.constant dense<0.000000e+00> : vector<16x2xf32>
    %38 = tpu.matmul %36, %37, %cst_20 {dimension_numbers = #tpu.dot_dimension_numbers<[1], [0], [0], [1], [0, 0, 1, 1], [], []>} : vector<16x32xf32>, vector<32x2xf32>, vector<16x2xf32> -> vector<16x2xf32>
    %c0_21 = arith.constant 0 : index
    %c0_22 = arith.constant 0 : index
    %39 = vector.load %arg8[%c0_21, %c0_22] : memref<1x2xf32, #tpu.memory_space<vmem>>, vector<1x2xf32>
    %40 = vector.broadcast %39 : vector<1x2xf32> to vector<16x2xf32>
    %41 = arith.addf %38, %40 : vector<16x2xf32>
    %c0_23 = arith.constant 0 : index
    %c0_24 = arith.constant 0 : index
    %42 = vector.load %arg2[%c0_23, %c0_24] : memref<16x2xf32, #tpu.memory_space<vmem>>, vector<16x2xf32>
    %cst_25 = arith.constant 0.000000e+00 : f32
    %cst_26 = arith.constant 1.000000e+00 : f32
    %43 = vector.broadcast %cst_25 : f32 to vector<16x2xf32>
    %44 = arith.maximumf %43, %42 : vector<16x2xf32>
    %45 = vector.broadcast %cst_26 : f32 to vector<16x2xf32>
    %46 = arith.minimumf %45, %44 : vector<16x2xf32>
    %cst_27 = arith.constant 1.000000e-03 : f32
    %47 = vector.broadcast %cst_27 : f32 to vector<16x2xf32>
    %48 = arith.maximumf %46, %47 : vector<16x2xf32>
    %cst_28 = arith.constant 1.000000e+00 : f32
    %49 = vector.broadcast %cst_28 : f32 to vector<16x2xf32>
    %50 = arith.subf %49, %46 : vector<16x2xf32>
    %cst_29 = arith.constant 1.000000e-03 : f32
    %51 = vector.broadcast %cst_29 : f32 to vector<16x2xf32>
    %52 = arith.maximumf %50, %51 : vector<16x2xf32>
    %53 = arith.divf %48, %52 : vector<16x2xf32>
    %54 = math.log %53 : vector<16x2xf32>
    %55 = arith.addf %54, %41 : vector<16x2xf32>
    %56 = arith.negf %55 : vector<16x2xf32>
    %57 = math.exp %56 : vector<16x2xf32>
    %cst_30 = arith.constant 1.000000e+00 : f32
    %58 = vector.broadcast %cst_30 : f32 to vector<16x2xf32>
    %59 = arith.addf %58, %57 : vector<16x2xf32>
    %60 = arith.divf %58, %59 : vector<16x2xf32>
    %c0_31 = arith.constant 0 : index
    %c0_32 = arith.constant 0 : index
    %61 = vector.load %arg9[%c0_31, %c0_32] : memref<16x2xf32, #tpu.memory_space<vmem>>, vector<16x2xf32>
    tpu.vector_store %arg9[%c0_31, %c0_32], %60 {strides = array<i32>} : memref<16x2xf32, #tpu.memory_space<vmem>>, vector<16x2xf32>,
    return
  }
  func.func @transform_0(%arg0: i32) -> (i32, i32) {
    %c0_i32 = arith.constant 0 : i32
    %c0_i32_0 = arith.constant 0 : i32
    %c0_i32_1 = arith.constant 0 : i32
    return %c0_i32, %c0_i32_0 : i32, i32
  }
  func.func @transform_1(%arg0: i32) -> (i32, i32) {
    %c0_i32 = arith.constant 0 : i32
    %c0_i32_0 = arith.constant 0 : i32
    %c0_i32_1 = arith.constant 0 : i32
    return %c0_i32, %c0_i32_0 : i32, i32
  }
  func.func @transform_2(%arg0: i32) -> (i32, i32) {
    %c0_i32 = arith.constant 0 : i32
    %c0_i32_0 = arith.constant 0 : i32
    %c0_i32_1 = arith.constant 0 : i32
    return %c0_i32, %c0_i32_0 : i32, i32
  }
  func.func @transform_3(%arg0: i32) -> (i32, i32) {
    %c0_i32 = arith.constant 0 : i32
    %c0_i32_0 = arith.constant 0 : i32
    %c0_i32_1 = arith.constant 0 : i32
    return %c0_i32, %c0_i32_0 : i32, i32
  }
  func.func @transform_4(%arg0: i32) -> (i32, i32) {
    %c0_i32 = arith.constant 0 : i32
    %c0_i32_0 = arith.constant 0 : i32
    %c0_i32_1 = arith.constant 0 : i32
    return %c0_i32, %c0_i32_0 : i32, i32
  }
  func.func @transform_5(%arg0: i32) -> (i32, i32) {
    %c0_i32 = arith.constant 0 : i32
    %c0_i32_0 = arith.constant 0 : i32
    %c0_i32_1 = arith.constant 0 : i32
    return %c0_i32, %c0_i32_0 : i32, i32
  }
  func.func @transform_6(%arg0: i32) -> (i32, i32) {
    %c0_i32 = arith.constant 0 : i32
    %c0_i32_0 = arith.constant 0 : i32
    %c0_i32_1 = arith.constant 0 : i32
    return %c0_i32, %c0_i32_0 : i32, i32
  }
  func.func @transform_7(%arg0: i32) -> (i32, i32) {
    %c0_i32 = arith.constant 0 : i32
    %c0_i32_0 = arith.constant 0 : i32
    %c0_i32_1 = arith.constant 0 : i32
    return %c0_i32, %c0_i32_0 : i32, i32
  }
  func.func @transform_8(%arg0: i32) -> (i32, i32) {
    %c0_i32 = arith.constant 0 : i32
    %c0_i32_0 = arith.constant 0 : i32
    %c0_i32_1 = arith.constant 0 : i32
    return %c0_i32, %c0_i32_0 : i32, i32
  }
}

module attributes {stable_mosaic.version = 11 : i64} {
  func.func @_decoder_layer_kernel(%arg0: i32, %arg1: memref<1x8x32xf32, #tpu.memory_space<vmem>>, %arg2: memref<1x16x32xf32, #tpu.memory_space<vmem>>, %arg3: memref<1x16x32xf32, #tpu.memory_space<vmem>>, %arg4: memref<1x8x32xf32, #tpu.memory_space<vmem>>, %arg5: memref<1x1x8xf32, #tpu.memory_space<vmem>>, %arg6: memref<1x1x16xf32, #tpu.memory_space<vmem>>, %arg7: memref<32x32xf32, #tpu.memory_space<vmem>>, %arg8: memref<1x32xf32, #tpu.memory_space<vmem>>, %arg9: memref<32x32xf32, #tpu.memory_space<vmem>>, %arg10: memref<1x32xf32, #tpu.memory_space<vmem>>, %arg11: memref<32x96xf32, #tpu.memory_space<vmem>>, %arg12: memref<1x96xf32, #tpu.memory_space<vmem>>, %arg13: memref<32x32xf32, #tpu.memory_space<vmem>>, %arg14: memref<1x32xf32, #tpu.memory_space<vmem>>, %arg15: memref<32x96xf32, #tpu.memory_space<vmem>>, %arg16: memref<1x96xf32, #tpu.memory_space<vmem>>, %arg17: memref<32x32xf32, #tpu.memory_space<vmem>>, %arg18: memref<1x32xf32, #tpu.memory_space<vmem>>, %arg19: memref<32x64xf32, #tpu.memory_space<vmem>>, %arg20: memref<1x64xf32, #tpu.memory_space<vmem>>, %arg21: memref<64x32xf32, #tpu.memory_space<vmem>>, %arg22: memref<1x32xf32, #tpu.memory_space<vmem>>, %arg23: memref<1x32xf32, #tpu.memory_space<vmem>>, %arg24: memref<1x32xf32, #tpu.memory_space<vmem>>, %arg25: memref<1x32xf32, #tpu.memory_space<vmem>>, %arg26: memref<1x32xf32, #tpu.memory_space<vmem>>, %arg27: memref<1x32xf32, #tpu.memory_space<vmem>>, %arg28: memref<1x32xf32, #tpu.memory_space<vmem>>, %arg29: memref<1x8x32xf32, #tpu.memory_space<vmem>>, %arg30: memref<1x8x16xf32, #tpu.memory_space<vmem>>) attributes {dimension_semantics = [#tpu.dimension_semantics<parallel>], iteration_bounds = array<i64: 2>, scalar_prefetch = 0 : i64, scratch_operands = 0 : i64, tpu.core_type = #tpu.core_type<tc>, window_params = [{transform_indices = @transform_0, window_bounds = array<i64: 1, 8, 32>}, {transform_indices = @transform_1, window_bounds = array<i64: 1, 16, 32>}, {transform_indices = @transform_2, window_bounds = array<i64: 1, 16, 32>}, {transform_indices = @transform_3, window_bounds = array<i64: 1, 8, 32>}, {transform_indices = @transform_4, window_bounds = array<i64: 1, 1, 8>}, {transform_indices = @transform_5, window_bounds = array<i64: 1, 1, 16>}, {pipeline_mode = #tpu.pipeline_mode<synchronous>, transform_indices = @transform_6, window_bounds = array<i64: 32, 32>}, {pipeline_mode = #tpu.pipeline_mode<synchronous>, transform_indices = @transform_7, window_bounds = array<i64: 1, 32>}, {pipeline_mode = #tpu.pipeline_mode<synchronous>, transform_indices = @transform_8, window_bounds = array<i64: 32, 32>}, {pipeline_mode = #tpu.pipeline_mode<synchronous>, transform_indices = @transform_9, window_bounds = array<i64: 1, 32>}, {pipeline_mode = #tpu.pipeline_mode<synchronous>, transform_indices = @transform_10, window_bounds = array<i64: 32, 96>}, {pipeline_mode = #tpu.pipeline_mode<synchronous>, transform_indices = @transform_11, window_bounds = array<i64: 1, 96>}, {pipeline_mode = #tpu.pipeline_mode<synchronous>, transform_indices = @transform_12, window_bounds = array<i64: 32, 32>}, {pipeline_mode = #tpu.pipeline_mode<synchronous>, transform_indices = @transform_13, window_bounds = array<i64: 1, 32>}, {pipeline_mode = #tpu.pipeline_mode<synchronous>, transform_indices = @transform_14, window_bounds = array<i64: 32, 96>}, {pipeline_mode = #tpu.pipeline_mode<synchronous>, transform_indices = @transform_15, window_bounds = array<i64: 1, 96>}, {pipeline_mode = #tpu.pipeline_mode<synchronous>, transform_indices = @transform_16, window_bounds = array<i64: 32, 32>}, {pipeline_mode = #tpu.pipeline_mode<synchronous>, transform_indices = @transform_17, window_bounds = array<i64: 1, 32>}, {pipeline_mode = #tpu.pipeline_mode<synchronous>, transform_indices = @transform_18, window_bounds = array<i64: 32, 64>}, {pipeline_mode = #tpu.pipeline_mode<synchronous>, transform_indices = @transform_19, window_bounds = array<i64: 1, 64>}, {pipeline_mode = #tpu.pipeline_mode<synchronous>, transform_indices = @transform_20, window_bounds = array<i64: 64, 32>}, {pipeline_mode = #tpu.pipeline_mode<synchronous>, transform_indices = @transform_21, window_bounds = array<i64: 1, 32>}, {pipeline_mode = #tpu.pipeline_mode<synchronous>, transform_indices = @transform_22, window_bounds = array<i64: 1, 32>}, {pipeline_mode = #tpu.pipeline_mode<synchronous>, transform_indices = @transform_23, window_bounds = array<i64: 1, 32>}, {pipeline_mode = #tpu.pipeline_mode<synchronous>, transform_indices = @transform_24, window_bounds = array<i64: 1, 32>}, {pipeline_mode = #tpu.pipeline_mode<synchronous>, transform_indices = @transform_25, window_bounds = array<i64: 1, 32>}, {pipeline_mode = #tpu.pipeline_mode<synchronous>, transform_indices = @transform_26, window_bounds = array<i64: 1, 32>}, {pipeline_mode = #tpu.pipeline_mode<synchronous>, transform_indices = @transform_27, window_bounds = array<i64: 1, 32>}, {transform_indices = @transform_28, window_bounds = array<i64: 1, 8, 32>}, {transform_indices = @transform_29, window_bounds = array<i64: 1, 8, 16>}]} {
    %c0 = arith.constant 0 : index
    %c0_0 = arith.constant 0 : index
    %c0_1 = arith.constant 0 : index
    %0 = vector.load %arg1[%c0, %c0_0, %c0_1] : memref<1x8x32xf32, #tpu.memory_space<vmem>>, vector<1x8x32xf32>
    %1 = vector.shape_cast %0 : vector<1x8x32xf32> to vector<8x32xf32>
    %c0_2 = arith.constant 0 : index
    %c0_3 = arith.constant 0 : index
    %c0_4 = arith.constant 0 : index
    %2 = vector.load %arg2[%c0_2, %c0_3, %c0_4] : memref<1x16x32xf32, #tpu.memory_space<vmem>>, vector<1x16x32xf32>
    %3 = vector.shape_cast %2 : vector<1x16x32xf32> to vector<16x32xf32>
    %c0_5 = arith.constant 0 : index
    %c0_6 = arith.constant 0 : index
    %c0_7 = arith.constant 0 : index
    %4 = vector.load %arg3[%c0_5, %c0_6, %c0_7] : memref<1x16x32xf32, #tpu.memory_space<vmem>>, vector<1x16x32xf32>
    %5 = vector.shape_cast %4 : vector<1x16x32xf32> to vector<16x32xf32>
    %c0_8 = arith.constant 0 : index
    %c0_9 = arith.constant 0 : index
    %c0_10 = arith.constant 0 : index
    %6 = vector.load %arg4[%c0_8, %c0_9, %c0_10] : memref<1x8x32xf32, #tpu.memory_space<vmem>>, vector<1x8x32xf32>
    %7 = vector.shape_cast %6 : vector<1x8x32xf32> to vector<8x32xf32>
    %c0_11 = arith.constant 0 : index
    %c0_12 = arith.constant 0 : index
    %c0_13 = arith.constant 0 : index
    %8 = vector.load %arg5[%c0_11, %c0_12, %c0_13] : memref<1x1x8xf32, #tpu.memory_space<vmem>>, vector<1x1x8xf32>
    %9 = vector.shape_cast %8 : vector<1x1x8xf32> to vector<1x8xf32>
    %c0_14 = arith.constant 0 : index
    %c0_15 = arith.constant 0 : index
    %c0_16 = arith.constant 0 : index
    %10 = vector.load %arg6[%c0_14, %c0_15, %c0_16] : memref<1x1x16xf32, #tpu.memory_space<vmem>>, vector<1x1x16xf32>
    %11 = vector.shape_cast %10 : vector<1x1x16xf32> to vector<1x16xf32>
    %c0_17 = arith.constant 0 : index
    %c0_18 = arith.constant 0 : index
    %12 = vector.load %arg7[%c0_17, %c0_18] : memref<32x32xf32, #tpu.memory_space<vmem>>, vector<32x32xf32>
    %cst = arith.constant dense<0.000000e+00> : vector<8x32xf32>
    %13 = tpu.matmul %7, %12, %cst {dimension_numbers = #tpu.dot_dimension_numbers<[1], [0], [0], [1], [0, 0, 1, 1], [], []>} : vector<8x32xf32>, vector<32x32xf32>, vector<8x32xf32> -> vector<8x32xf32>
    %c0_19 = arith.constant 0 : index
    %c0_20 = arith.constant 0 : index
    %14 = vector.load %arg8[%c0_19, %c0_20] : memref<1x32xf32, #tpu.memory_space<vmem>>, vector<1x32xf32>
    %15 = vector.broadcast %14 : vector<1x32xf32> to vector<8x32xf32>
    %16 = arith.addf %13, %15 : vector<8x32xf32>
    %cst_21 = arith.constant 5.000000e-01 : f32
    %17 = vector.broadcast %cst_21 : f32 to vector<8x32xf32>
    %18 = arith.mulf %17, %16 : vector<8x32xf32>
    %cst_22 = arith.constant 4.471500e-02 : f32
    %19 = vector.broadcast %cst_22 : f32 to vector<8x32xf32>
    %20 = arith.mulf %19, %16 : vector<8x32xf32>
    %21 = arith.mulf %20, %16 : vector<8x32xf32>
    %22 = arith.mulf %21, %16 : vector<8x32xf32>
    %23 = arith.addf %16, %22 : vector<8x32xf32>
    %cst_23 = arith.constant 0.797884583 : f32
    %24 = vector.broadcast %cst_23 : f32 to vector<8x32xf32>
    %25 = arith.mulf %24, %23 : vector<8x32xf32>
    %26 = math.tanh %25 : vector<8x32xf32>
    %cst_24 = arith.constant 1.000000e+00 : f32
    %27 = vector.broadcast %cst_24 : f32 to vector<8x32xf32>
    %28 = arith.addf %27, %26 : vector<8x32xf32>
    %29 = arith.mulf %18, %28 : vector<8x32xf32>
    %c0_25 = arith.constant 0 : index
    %c0_26 = arith.constant 0 : index
    %30 = vector.load %arg9[%c0_25, %c0_26] : memref<32x32xf32, #tpu.memory_space<vmem>>, vector<32x32xf32>
    %cst_27 = arith.constant dense<0.000000e+00> : vector<8x32xf32>
    %31 = tpu.matmul %29, %30, %cst_27 {dimension_numbers = #tpu.dot_dimension_numbers<[1], [0], [0], [1], [0, 0, 1, 1], [], []>} : vector<8x32xf32>, vector<32x32xf32>, vector<8x32xf32> -> vector<8x32xf32>
    %c0_28 = arith.constant 0 : index
    %c0_29 = arith.constant 0 : index
    %32 = vector.load %arg10[%c0_28, %c0_29] : memref<1x32xf32, #tpu.memory_space<vmem>>, vector<1x32xf32>
    %33 = vector.broadcast %32 : vector<1x32xf32> to vector<8x32xf32>
    %34 = arith.addf %31, %33 : vector<8x32xf32>
    %35 = arith.addf %1, %34 : vector<8x32xf32>
    %36 = arith.addf %1, %34 : vector<8x32xf32>
    %c0_30 = arith.constant 0 : index
    %c0_31 = arith.constant 0 : index
    %37 = vector.load %arg11[%c0_30, %c0_31] : memref<32x96xf32, #tpu.memory_space<vmem>>, vector<32x96xf32>
    %c0_32 = arith.constant 0 : index
    %c0_33 = arith.constant 0 : index
    %38 = vector.load %arg12[%c0_32, %c0_33] : memref<1x96xf32, #tpu.memory_space<vmem>>, vector<1x96xf32>
    %c0_34 = arith.constant 0 : index
    %c0_35 = arith.constant 0 : index
    %39 = vector.load %arg13[%c0_34, %c0_35] : memref<32x32xf32, #tpu.memory_space<vmem>>, vector<32x32xf32>
    %c0_36 = arith.constant 0 : index
    %c0_37 = arith.constant 0 : index
    %40 = vector.load %arg14[%c0_36, %c0_37] : memref<1x32xf32, #tpu.memory_space<vmem>>, vector<1x32xf32>
    %41 = vector.extract_strided_slice %37 {offsets = [0, 0], sizes = [32, 32], strides = [1, 1]} : vector<32x96xf32> to vector<32x32xf32>
    %cst_38 = arith.constant dense<0.000000e+00> : vector<8x32xf32>
    %42 = tpu.matmul %35, %41, %cst_38 {dimension_numbers = #tpu.dot_dimension_numbers<[1], [0], [0], [1], [0, 0, 1, 1], [], []>} : vector<8x32xf32>, vector<32x32xf32>, vector<8x32xf32> -> vector<8x32xf32>
    %43 = vector.extract_strided_slice %38 {offsets = [0, 0], sizes = [1, 32], strides = [1, 1]} : vector<1x96xf32> to vector<1x32xf32>
    %44 = vector.broadcast %43 : vector<1x32xf32> to vector<8x32xf32>
    %45 = arith.addf %42, %44 : vector<8x32xf32>
    %46 = vector.extract_strided_slice %37 {offsets = [0, 32], sizes = [32, 32], strides = [1, 1]} : vector<32x96xf32> to vector<32x32xf32>
    %cst_39 = arith.constant dense<0.000000e+00> : vector<8x32xf32>
    %47 = tpu.matmul %36, %46, %cst_39 {dimension_numbers = #tpu.dot_dimension_numbers<[1], [0], [0], [1], [0, 0, 1, 1], [], []>} : vector<8x32xf32>, vector<32x32xf32>, vector<8x32xf32> -> vector<8x32xf32>
    %48 = vector.extract_strided_slice %38 {offsets = [0, 32], sizes = [1, 32], strides = [1, 1]} : vector<1x96xf32> to vector<1x32xf32>
    %49 = vector.broadcast %48 : vector<1x32xf32> to vector<8x32xf32>
    %50 = arith.addf %47, %49 : vector<8x32xf32>
    %51 = vector.extract_strided_slice %37 {offsets = [0, 64], sizes = [32, 32], strides = [1, 1]} : vector<32x96xf32> to vector<32x32xf32>
    %cst_40 = arith.constant dense<0.000000e+00> : vector<8x32xf32>
    %52 = tpu.matmul %1, %51, %cst_40 {dimension_numbers = #tpu.dot_dimension_numbers<[1], [0], [0], [1], [0, 0, 1, 1], [], []>} : vector<8x32xf32>, vector<32x32xf32>, vector<8x32xf32> -> vector<8x32xf32>
    %53 = vector.extract_strided_slice %38 {offsets = [0, 64], sizes = [1, 32], strides = [1, 1]} : vector<1x96xf32> to vector<1x32xf32>
    %54 = vector.broadcast %53 : vector<1x32xf32> to vector<8x32xf32>
    %55 = arith.addf %52, %54 : vector<8x32xf32>
    %56 = vector.extract_strided_slice %45 {offsets = [0, 0], sizes = [8, 8], strides = [1, 1]} : vector<8x32xf32> to vector<8x8xf32>
    %57 = vector.extract_strided_slice %50 {offsets = [0, 0], sizes = [8, 8], strides = [1, 1]} : vector<8x32xf32> to vector<8x8xf32>
    %cst_41 = arith.constant dense<0.000000e+00> : vector<8x8xf32>
    %58 = tpu.matmul %56, %57, %cst_41 {dimension_numbers = #tpu.dot_dimension_numbers<[1], [1], [0], [0], [0, 0, 1, 0], [], []>} : vector<8x8xf32>, vector<8x8xf32>, vector<8x8xf32> -> vector<8x8xf32>
    %cst_42 = arith.constant 0.353553385 : f32
    %59 = vector.broadcast %cst_42 : f32 to vector<8x8xf32>
    %60 = arith.mulf %58, %59 : vector<8x8xf32>
    %61 = vector.broadcast %9 : vector<1x8xf32> to vector<8x8xf32>
    %62 = arith.addf %60, %61 : vector<8x8xf32>
    %cst_43 = arith.constant dense<0xFF800000> : vector<8xf32>
    %63 = vector.multi_reduction <maximumf>, %62, %cst_43 [1] : vector<8x8xf32> to vector<8xf32>
    %64 = vector.shape_cast %63 : vector<8xf32> to vector<8x1xf32>
    %65 = vector.broadcast %64 : vector<8x1xf32> to vector<8x8xf32>
    %66 = arith.subf %62, %65 : vector<8x8xf32>
    %67 = math.exp %66 : vector<8x8xf32>
    %cst_44 = arith.constant dense<0.000000e+00> : vector<8xf32>
    %68 = vector.multi_reduction <add>, %67, %cst_44 [1] : vector<8x8xf32> to vector<8xf32>
    %69 = vector.shape_cast %68 : vector<8xf32> to vector<8x1xf32>
    %70 = tpu.reciprocal %69 {approx = true} : vector<8x1xf32> -> vector<8x1xf32>
    %71 = vector.broadcast %70 : vector<8x1xf32> to vector<8x8xf32>
    %72 = arith.mulf %67, %71 : vector<8x8xf32>
    %73 = vector.extract_strided_slice %55 {offsets = [0, 0], sizes = [8, 8], strides = [1, 1]} : vector<8x32xf32> to vector<8x8xf32>
    %cst_45 = arith.constant dense<0.000000e+00> : vector<8x8xf32>
    %74 = tpu.matmul %72, %73, %cst_45 {dimension_numbers = #tpu.dot_dimension_numbers<[1], [0], [0], [1], [0, 0, 1, 1], [], []>} : vector<8x8xf32>, vector<8x8xf32>, vector<8x8xf32> -> vector<8x8xf32>
    %75 = vector.extract_strided_slice %45 {offsets = [0, 8], sizes = [8, 8], strides = [1, 1]} : vector<8x32xf32> to vector<8x8xf32>
    %76 = vector.extract_strided_slice %50 {offsets = [0, 8], sizes = [8, 8], strides = [1, 1]} : vector<8x32xf32> to vector<8x8xf32>
    %cst_46 = arith.constant dense<0.000000e+00> : vector<8x8xf32>
    %77 = tpu.matmul %75, %76, %cst_46 {dimension_numbers = #tpu.dot_dimension_numbers<[1], [1], [0], [0], [0, 0, 1, 0], [], []>} : vector<8x8xf32>, vector<8x8xf32>, vector<8x8xf32> -> vector<8x8xf32>
    %cst_47 = arith.constant 0.353553385 : f32
    %78 = vector.broadcast %cst_47 : f32 to vector<8x8xf32>
    %79 = arith.mulf %77, %78 : vector<8x8xf32>
    %80 = vector.broadcast %9 : vector<1x8xf32> to vector<8x8xf32>
    %81 = arith.addf %79, %80 : vector<8x8xf32>
    %cst_48 = arith.constant dense<0xFF800000> : vector<8xf32>
    %82 = vector.multi_reduction <maximumf>, %81, %cst_48 [1] : vector<8x8xf32> to vector<8xf32>
    %83 = vector.shape_cast %82 : vector<8xf32> to vector<8x1xf32>
    %84 = vector.broadcast %83 : vector<8x1xf32> to vector<8x8xf32>
    %85 = arith.subf %81, %84 : vector<8x8xf32>
    %86 = math.exp %85 : vector<8x8xf32>
    %cst_49 = arith.constant dense<0.000000e+00> : vector<8xf32>
    %87 = vector.multi_reduction <add>, %86, %cst_49 [1] : vector<8x8xf32> to vector<8xf32>
    %88 = vector.shape_cast %87 : vector<8xf32> to vector<8x1xf32>
    %89 = tpu.reciprocal %88 {approx = true} : vector<8x1xf32> -> vector<8x1xf32>
    %90 = vector.broadcast %89 : vector<8x1xf32> to vector<8x8xf32>
    %91 = arith.mulf %86, %90 : vector<8x8xf32>
    %92 = vector.extract_strided_slice %55 {offsets = [0, 8], sizes = [8, 8], strides = [1, 1]} : vector<8x32xf32> to vector<8x8xf32>
    %cst_50 = arith.constant dense<0.000000e+00> : vector<8x8xf32>
    %93 = tpu.matmul %91, %92, %cst_50 {dimension_numbers = #tpu.dot_dimension_numbers<[1], [0], [0], [1], [0, 0, 1, 1], [], []>} : vector<8x8xf32>, vector<8x8xf32>, vector<8x8xf32> -> vector<8x8xf32>
    %94 = vector.extract_strided_slice %45 {offsets = [0, 16], sizes = [8, 8], strides = [1, 1]} : vector<8x32xf32> to vector<8x8xf32>
    %95 = vector.extract_strided_slice %50 {offsets = [0, 16], sizes = [8, 8], strides = [1, 1]} : vector<8x32xf32> to vector<8x8xf32>
    %cst_51 = arith.constant dense<0.000000e+00> : vector<8x8xf32>
    %96 = tpu.matmul %94, %95, %cst_51 {dimension_numbers = #tpu.dot_dimension_numbers<[1], [1], [0], [0], [0, 0, 1, 0], [], []>} : vector<8x8xf32>, vector<8x8xf32>, vector<8x8xf32> -> vector<8x8xf32>
    %cst_52 = arith.constant 0.353553385 : f32
    %97 = vector.broadcast %cst_52 : f32 to vector<8x8xf32>
    %98 = arith.mulf %96, %97 : vector<8x8xf32>
    %99 = vector.broadcast %9 : vector<1x8xf32> to vector<8x8xf32>
    %100 = arith.addf %98, %99 : vector<8x8xf32>
    %cst_53 = arith.constant dense<0xFF800000> : vector<8xf32>
    %101 = vector.multi_reduction <maximumf>, %100, %cst_53 [1] : vector<8x8xf32> to vector<8xf32>
    %102 = vector.shape_cast %101 : vector<8xf32> to vector<8x1xf32>
    %103 = vector.broadcast %102 : vector<8x1xf32> to vector<8x8xf32>
    %104 = arith.subf %100, %103 : vector<8x8xf32>
    %105 = math.exp %104 : vector<8x8xf32>
    %cst_54 = arith.constant dense<0.000000e+00> : vector<8xf32>
    %106 = vector.multi_reduction <add>, %105, %cst_54 [1] : vector<8x8xf32> to vector<8xf32>
    %107 = vector.shape_cast %106 : vector<8xf32> to vector<8x1xf32>
    %108 = tpu.reciprocal %107 {approx = true} : vector<8x1xf32> -> vector<8x1xf32>
    %109 = vector.broadcast %108 : vector<8x1xf32> to vector<8x8xf32>
    %110 = arith.mulf %105, %109 : vector<8x8xf32>
    %111 = vector.extract_strided_slice %55 {offsets = [0, 16], sizes = [8, 8], strides = [1, 1]} : vector<8x32xf32> to vector<8x8xf32>
    %cst_55 = arith.constant dense<0.000000e+00> : vector<8x8xf32>
    %112 = tpu.matmul %110, %111, %cst_55 {dimension_numbers = #tpu.dot_dimension_numbers<[1], [0], [0], [1], [0, 0, 1, 1], [], []>} : vector<8x8xf32>, vector<8x8xf32>, vector<8x8xf32> -> vector<8x8xf32>
    %113 = vector.extract_strided_slice %45 {offsets = [0, 24], sizes = [8, 8], strides = [1, 1]} : vector<8x32xf32> to vector<8x8xf32>
    %114 = vector.extract_strided_slice %50 {offsets = [0, 24], sizes = [8, 8], strides = [1, 1]} : vector<8x32xf32> to vector<8x8xf32>
    %cst_56 = arith.constant dense<0.000000e+00> : vector<8x8xf32>
    %115 = tpu.matmul %113, %114, %cst_56 {dimension_numbers = #tpu.dot_dimension_numbers<[1], [1], [0], [0], [0, 0, 1, 0], [], []>} : vector<8x8xf32>, vector<8x8xf32>, vector<8x8xf32> -> vector<8x8xf32>
    %cst_57 = arith.constant 0.353553385 : f32
    %116 = vector.broadcast %cst_57 : f32 to vector<8x8xf32>
    %117 = arith.mulf %115, %116 : vector<8x8xf32>
    %118 = vector.broadcast %9 : vector<1x8xf32> to vector<8x8xf32>
    %119 = arith.addf %117, %118 : vector<8x8xf32>
    %cst_58 = arith.constant dense<0xFF800000> : vector<8xf32>
    %120 = vector.multi_reduction <maximumf>, %119, %cst_58 [1] : vector<8x8xf32> to vector<8xf32>
    %121 = vector.shape_cast %120 : vector<8xf32> to vector<8x1xf32>
    %122 = vector.broadcast %121 : vector<8x1xf32> to vector<8x8xf32>
    %123 = arith.subf %119, %122 : vector<8x8xf32>
    %124 = math.exp %123 : vector<8x8xf32>
    %cst_59 = arith.constant dense<0.000000e+00> : vector<8xf32>
    %125 = vector.multi_reduction <add>, %124, %cst_59 [1] : vector<8x8xf32> to vector<8xf32>
    %126 = vector.shape_cast %125 : vector<8xf32> to vector<8x1xf32>
    %127 = tpu.reciprocal %126 {approx = true} : vector<8x1xf32> -> vector<8x1xf32>
    %128 = vector.broadcast %127 : vector<8x1xf32> to vector<8x8xf32>
    %129 = arith.mulf %124, %128 : vector<8x8xf32>
    %130 = vector.extract_strided_slice %55 {offsets = [0, 24], sizes = [8, 8], strides = [1, 1]} : vector<8x32xf32> to vector<8x8xf32>
    %cst_60 = arith.constant dense<0.000000e+00> : vector<8x8xf32>
    %131 = tpu.matmul %129, %130, %cst_60 {dimension_numbers = #tpu.dot_dimension_numbers<[1], [0], [0], [1], [0, 0, 1, 1], [], []>} : vector<8x8xf32>, vector<8x8xf32>, vector<8x8xf32> -> vector<8x8xf32>
    %132 = tpu.concatenate %74, %93, %112, %131 in 1 : vector<8x8xf32>, vector<8x8xf32>, vector<8x8xf32>, vector<8x8xf32> -> vector<8x32xf32>
    %cst_61 = arith.constant dense<0.000000e+00> : vector<8x32xf32>
    %133 = tpu.matmul %132, %39, %cst_61 {dimension_numbers = #tpu.dot_dimension_numbers<[1], [0], [0], [1], [0, 0, 1, 1], [], []>} : vector<8x32xf32>, vector<32x32xf32>, vector<8x32xf32> -> vector<8x32xf32>
    %134 = vector.broadcast %40 : vector<1x32xf32> to vector<8x32xf32>
    %135 = arith.addf %133, %134 : vector<8x32xf32>
    %136 = arith.addf %1, %135 : vector<8x32xf32>
    %c0_62 = arith.constant 0 : index
    %c0_63 = arith.constant 0 : index
    %137 = vector.load %arg23[%c0_62, %c0_63] : memref<1x32xf32, #tpu.memory_space<vmem>>, vector<1x32xf32>
    %c0_64 = arith.constant 0 : index
    %c0_65 = arith.constant 0 : index
    %138 = vector.load %arg24[%c0_64, %c0_65] : memref<1x32xf32, #tpu.memory_space<vmem>>, vector<1x32xf32>
    %cst_66 = arith.constant dense<0.000000e+00> : vector<8xf32>
    %139 = vector.multi_reduction <add>, %136, %cst_66 [1] : vector<8x32xf32> to vector<8xf32>
    %140 = vector.shape_cast %139 : vector<8xf32> to vector<8x1xf32>
    %cst_67 = arith.constant 3.200000e+01 : f32
    %141 = vector.broadcast %cst_67 : f32 to vector<8x1xf32>
    %142 = arith.divf %140, %141 : vector<8x1xf32>
    %143 = vector.broadcast %142 : vector<8x1xf32> to vector<8x32xf32>
    %144 = arith.subf %136, %143 : vector<8x32xf32>
    %145 = vector.broadcast %142 : vector<8x1xf32> to vector<8x32xf32>
    %146 = arith.subf %136, %145 : vector<8x32xf32>
    %147 = arith.mulf %144, %146 : vector<8x32xf32>
    %cst_68 = arith.constant dense<0.000000e+00> : vector<8xf32>
    %148 = vector.multi_reduction <add>, %147, %cst_68 [1] : vector<8x32xf32> to vector<8xf32>
    %149 = vector.shape_cast %148 : vector<8xf32> to vector<8x1xf32>
    %cst_69 = arith.constant 3.200000e+01 : f32
    %150 = vector.broadcast %cst_69 : f32 to vector<8x1xf32>
    %151 = arith.divf %149, %150 : vector<8x1xf32>
    %152 = vector.broadcast %142 : vector<8x1xf32> to vector<8x32xf32>
    %153 = arith.subf %136, %152 : vector<8x32xf32>
    %cst_70 = arith.constant 9.99999974E-6 : f32
    %154 = vector.broadcast %cst_70 : f32 to vector<8x1xf32>
    %155 = arith.addf %151, %154 : vector<8x1xf32>
    %156 = math.rsqrt %155 : vector<8x1xf32>
    %157 = vector.broadcast %156 : vector<8x1xf32> to vector<8x32xf32>
    %158 = arith.mulf %153, %157 : vector<8x32xf32>
    %159 = vector.broadcast %137 : vector<1x32xf32> to vector<8x32xf32>
    %160 = arith.mulf %158, %159 : vector<8x32xf32>
    %161 = vector.broadcast %138 : vector<1x32xf32> to vector<8x32xf32>
    %162 = arith.addf %160, %161 : vector<8x32xf32>
    %163 = arith.addf %162, %34 : vector<8x32xf32>
    %164 = arith.addf %3, %5 : vector<16x32xf32>
    %c0_71 = arith.constant 0 : index
    %c0_72 = arith.constant 0 : index
    %165 = vector.load %arg15[%c0_71, %c0_72] : memref<32x96xf32, #tpu.memory_space<vmem>>, vector<32x96xf32>
    %c0_73 = arith.constant 0 : index
    %c0_74 = arith.constant 0 : index
    %166 = vector.load %arg16[%c0_73, %c0_74] : memref<1x96xf32, #tpu.memory_space<vmem>>, vector<1x96xf32>
    %c0_75 = arith.constant 0 : index
    %c0_76 = arith.constant 0 : index
    %167 = vector.load %arg17[%c0_75, %c0_76] : memref<32x32xf32, #tpu.memory_space<vmem>>, vector<32x32xf32>
    %c0_77 = arith.constant 0 : index
    %c0_78 = arith.constant 0 : index
    %168 = vector.load %arg18[%c0_77, %c0_78] : memref<1x32xf32, #tpu.memory_space<vmem>>, vector<1x32xf32>
    %169 = vector.extract_strided_slice %165 {offsets = [0, 0], sizes = [32, 32], strides = [1, 1]} : vector<32x96xf32> to vector<32x32xf32>
    %cst_79 = arith.constant dense<0.000000e+00> : vector<8x32xf32>
    %170 = tpu.matmul %163, %169, %cst_79 {dimension_numbers = #tpu.dot_dimension_numbers<[1], [0], [0], [1], [0, 0, 1, 1], [], []>} : vector<8x32xf32>, vector<32x32xf32>, vector<8x32xf32> -> vector<8x32xf32>
    %171 = vector.extract_strided_slice %166 {offsets = [0, 0], sizes = [1, 32], strides = [1, 1]} : vector<1x96xf32> to vector<1x32xf32>
    %172 = vector.broadcast %171 : vector<1x32xf32> to vector<8x32xf32>
    %173 = arith.addf %170, %172 : vector<8x32xf32>
    %174 = vector.extract_strided_slice %165 {offsets = [0, 32], sizes = [32, 32], strides = [1, 1]} : vector<32x96xf32> to vector<32x32xf32>
    %cst_80 = arith.constant dense<0.000000e+00> : vector<16x32xf32>
    %175 = tpu.matmul %164, %174, %cst_80 {dimension_numbers = #tpu.dot_dimension_numbers<[1], [0], [0], [1], [0, 0, 1, 1], [], []>} : vector<16x32xf32>, vector<32x32xf32>, vector<16x32xf32> -> vector<16x32xf32>
    %176 = vector.extract_strided_slice %166 {offsets = [0, 32], sizes = [1, 32], strides = [1, 1]} : vector<1x96xf32> to vector<1x32xf32>
    %177 = vector.broadcast %176 : vector<1x32xf32> to vector<16x32xf32>
    %178 = arith.addf %175, %177 : vector<16x32xf32>
    %179 = vector.extract_strided_slice %165 {offsets = [0, 64], sizes = [32, 32], strides = [1, 1]} : vector<32x96xf32> to vector<32x32xf32>
    %cst_81 = arith.constant dense<0.000000e+00> : vector<16x32xf32>
    %180 = tpu.matmul %3, %179, %cst_81 {dimension_numbers = #tpu.dot_dimension_numbers<[1], [0], [0], [1], [0, 0, 1, 1], [], []>} : vector<16x32xf32>, vector<32x32xf32>, vector<16x32xf32> -> vector<16x32xf32>
    %181 = vector.extract_strided_slice %166 {offsets = [0, 64], sizes = [1, 32], strides = [1, 1]} : vector<1x96xf32> to vector<1x32xf32>
    %182 = vector.broadcast %181 : vector<1x32xf32> to vector<16x32xf32>
    %183 = arith.addf %180, %182 : vector<16x32xf32>
    %184 = vector.extract_strided_slice %173 {offsets = [0, 0], sizes = [8, 8], strides = [1, 1]} : vector<8x32xf32> to vector<8x8xf32>
    %185 = vector.extract_strided_slice %178 {offsets = [0, 0], sizes = [16, 8], strides = [1, 1]} : vector<16x32xf32> to vector<16x8xf32>
    %cst_82 = arith.constant dense<0.000000e+00> : vector<8x16xf32>
    %186 = tpu.matmul %184, %185, %cst_82 {dimension_numbers = #tpu.dot_dimension_numbers<[1], [1], [0], [0], [0, 0, 1, 0], [], []>} : vector<8x8xf32>, vector<16x8xf32>, vector<8x16xf32> -> vector<8x16xf32>
    %cst_83 = arith.constant 0.353553385 : f32
    %187 = vector.broadcast %cst_83 : f32 to vector<8x16xf32>
    %188 = arith.mulf %186, %187 : vector<8x16xf32>
    %189 = vector.broadcast %11 : vector<1x16xf32> to vector<8x16xf32>
    %190 = arith.addf %188, %189 : vector<8x16xf32>
    %cst_84 = arith.constant dense<0xFF800000> : vector<8xf32>
    %191 = vector.multi_reduction <maximumf>, %190, %cst_84 [1] : vector<8x16xf32> to vector<8xf32>
    %192 = vector.shape_cast %191 : vector<8xf32> to vector<8x1xf32>
    %193 = vector.broadcast %192 : vector<8x1xf32> to vector<8x16xf32>
    %194 = arith.subf %190, %193 : vector<8x16xf32>
    %195 = math.exp %194 : vector<8x16xf32>
    %cst_85 = arith.constant dense<0.000000e+00> : vector<8xf32>
    %196 = vector.multi_reduction <add>, %195, %cst_85 [1] : vector<8x16xf32> to vector<8xf32>
    %197 = vector.shape_cast %196 : vector<8xf32> to vector<8x1xf32>
    %198 = tpu.reciprocal %197 {approx = true} : vector<8x1xf32> -> vector<8x1xf32>
    %199 = vector.broadcast %198 : vector<8x1xf32> to vector<8x16xf32>
    %200 = arith.mulf %195, %199 : vector<8x16xf32>
    %201 = vector.extract_strided_slice %183 {offsets = [0, 0], sizes = [16, 8], strides = [1, 1]} : vector<16x32xf32> to vector<16x8xf32>
    %cst_86 = arith.constant dense<0.000000e+00> : vector<8x8xf32>
    %202 = tpu.matmul %200, %201, %cst_86 {dimension_numbers = #tpu.dot_dimension_numbers<[1], [0], [0], [1], [0, 0, 1, 1], [], []>} : vector<8x16xf32>, vector<16x8xf32>, vector<8x8xf32> -> vector<8x8xf32>
    %203 = vector.extract_strided_slice %173 {offsets = [0, 8], sizes = [8, 8], strides = [1, 1]} : vector<8x32xf32> to vector<8x8xf32>
    %204 = vector.extract_strided_slice %178 {offsets = [0, 8], sizes = [16, 8], strides = [1, 1]} : vector<16x32xf32> to vector<16x8xf32>
    %cst_87 = arith.constant dense<0.000000e+00> : vector<8x16xf32>
    %205 = tpu.matmul %203, %204, %cst_87 {dimension_numbers = #tpu.dot_dimension_numbers<[1], [1], [0], [0], [0, 0, 1, 0], [], []>} : vector<8x8xf32>, vector<16x8xf32>, vector<8x16xf32> -> vector<8x16xf32>
    %cst_88 = arith.constant 0.353553385 : f32
    %206 = vector.broadcast %cst_88 : f32 to vector<8x16xf32>
    %207 = arith.mulf %205, %206 : vector<8x16xf32>
    %208 = vector.broadcast %11 : vector<1x16xf32> to vector<8x16xf32>
    %209 = arith.addf %207, %208 : vector<8x16xf32>
    %cst_89 = arith.constant dense<0xFF800000> : vector<8xf32>
    %210 = vector.multi_reduction <maximumf>, %209, %cst_89 [1] : vector<8x16xf32> to vector<8xf32>
    %211 = vector.shape_cast %210 : vector<8xf32> to vector<8x1xf32>
    %212 = vector.broadcast %211 : vector<8x1xf32> to vector<8x16xf32>
    %213 = arith.subf %209, %212 : vector<8x16xf32>
    %214 = math.exp %213 : vector<8x16xf32>
    %cst_90 = arith.constant dense<0.000000e+00> : vector<8xf32>
    %215 = vector.multi_reduction <add>, %214, %cst_90 [1] : vector<8x16xf32> to vector<8xf32>
    %216 = vector.shape_cast %215 : vector<8xf32> to vector<8x1xf32>
    %217 = tpu.reciprocal %216 {approx = true} : vector<8x1xf32> -> vector<8x1xf32>
    %218 = vector.broadcast %217 : vector<8x1xf32> to vector<8x16xf32>
    %219 = arith.mulf %214, %218 : vector<8x16xf32>
    %220 = vector.extract_strided_slice %183 {offsets = [0, 8], sizes = [16, 8], strides = [1, 1]} : vector<16x32xf32> to vector<16x8xf32>
    %cst_91 = arith.constant dense<0.000000e+00> : vector<8x8xf32>
    %221 = tpu.matmul %219, %220, %cst_91 {dimension_numbers = #tpu.dot_dimension_numbers<[1], [0], [0], [1], [0, 0, 1, 1], [], []>} : vector<8x16xf32>, vector<16x8xf32>, vector<8x8xf32> -> vector<8x8xf32>
    %222 = arith.addf %200, %219 : vector<8x16xf32>
    %223 = vector.extract_strided_slice %173 {offsets = [0, 16], sizes = [8, 8], strides = [1, 1]} : vector<8x32xf32> to vector<8x8xf32>
    %224 = vector.extract_strided_slice %178 {offsets = [0, 16], sizes = [16, 8], strides = [1, 1]} : vector<16x32xf32> to vector<16x8xf32>
    %cst_92 = arith.constant dense<0.000000e+00> : vector<8x16xf32>
    %225 = tpu.matmul %223, %224, %cst_92 {dimension_numbers = #tpu.dot_dimension_numbers<[1], [1], [0], [0], [0, 0, 1, 0], [], []>} : vector<8x8xf32>, vector<16x8xf32>, vector<8x16xf32> -> vector<8x16xf32>
    %cst_93 = arith.constant 0.353553385 : f32
    %226 = vector.broadcast %cst_93 : f32 to vector<8x16xf32>
    %227 = arith.mulf %225, %226 : vector<8x16xf32>
    %228 = vector.broadcast %11 : vector<1x16xf32> to vector<8x16xf32>
    %229 = arith.addf %227, %228 : vector<8x16xf32>
    %cst_94 = arith.constant dense<0xFF800000> : vector<8xf32>
    %230 = vector.multi_reduction <maximumf>, %229, %cst_94 [1] : vector<8x16xf32> to vector<8xf32>
    %231 = vector.shape_cast %230 : vector<8xf32> to vector<8x1xf32>
    %232 = vector.broadcast %231 : vector<8x1xf32> to vector<8x16xf32>
    %233 = arith.subf %229, %232 : vector<8x16xf32>
    %234 = math.exp %233 : vector<8x16xf32>
    %cst_95 = arith.constant dense<0.000000e+00> : vector<8xf32>
    %235 = vector.multi_reduction <add>, %234, %cst_95 [1] : vector<8x16xf32> to vector<8xf32>
    %236 = vector.shape_cast %235 : vector<8xf32> to vector<8x1xf32>
    %237 = tpu.reciprocal %236 {approx = true} : vector<8x1xf32> -> vector<8x1xf32>
    %238 = vector.broadcast %237 : vector<8x1xf32> to vector<8x16xf32>
    %239 = arith.mulf %234, %238 : vector<8x16xf32>
    %240 = vector.extract_strided_slice %183 {offsets = [0, 16], sizes = [16, 8], strides = [1, 1]} : vector<16x32xf32> to vector<16x8xf32>
    %cst_96 = arith.constant dense<0.000000e+00> : vector<8x8xf32>
    %241 = tpu.matmul %239, %240, %cst_96 {dimension_numbers = #tpu.dot_dimension_numbers<[1], [0], [0], [1], [0, 0, 1, 1], [], []>} : vector<8x16xf32>, vector<16x8xf32>, vector<8x8xf32> -> vector<8x8xf32>
    %242 = arith.addf %222, %239 : vector<8x16xf32>
    %243 = vector.extract_strided_slice %173 {offsets = [0, 24], sizes = [8, 8], strides = [1, 1]} : vector<8x32xf32> to vector<8x8xf32>
    %244 = vector.extract_strided_slice %178 {offsets = [0, 24], sizes = [16, 8], strides = [1, 1]} : vector<16x32xf32> to vector<16x8xf32>
    %cst_97 = arith.constant dense<0.000000e+00> : vector<8x16xf32>
    %245 = tpu.matmul %243, %244, %cst_97 {dimension_numbers = #tpu.dot_dimension_numbers<[1], [1], [0], [0], [0, 0, 1, 0], [], []>} : vector<8x8xf32>, vector<16x8xf32>, vector<8x16xf32> -> vector<8x16xf32>
    %cst_98 = arith.constant 0.353553385 : f32
    %246 = vector.broadcast %cst_98 : f32 to vector<8x16xf32>
    %247 = arith.mulf %245, %246 : vector<8x16xf32>
    %248 = vector.broadcast %11 : vector<1x16xf32> to vector<8x16xf32>
    %249 = arith.addf %247, %248 : vector<8x16xf32>
    %cst_99 = arith.constant dense<0xFF800000> : vector<8xf32>
    %250 = vector.multi_reduction <maximumf>, %249, %cst_99 [1] : vector<8x16xf32> to vector<8xf32>
    %251 = vector.shape_cast %250 : vector<8xf32> to vector<8x1xf32>
    %252 = vector.broadcast %251 : vector<8x1xf32> to vector<8x16xf32>
    %253 = arith.subf %249, %252 : vector<8x16xf32>
    %254 = math.exp %253 : vector<8x16xf32>
    %cst_100 = arith.constant dense<0.000000e+00> : vector<8xf32>
    %255 = vector.multi_reduction <add>, %254, %cst_100 [1] : vector<8x16xf32> to vector<8xf32>
    %256 = vector.shape_cast %255 : vector<8xf32> to vector<8x1xf32>
    %257 = tpu.reciprocal %256 {approx = true} : vector<8x1xf32> -> vector<8x1xf32>
    %258 = vector.broadcast %257 : vector<8x1xf32> to vector<8x16xf32>
    %259 = arith.mulf %254, %258 : vector<8x16xf32>
    %260 = vector.extract_strided_slice %183 {offsets = [0, 24], sizes = [16, 8], strides = [1, 1]} : vector<16x32xf32> to vector<16x8xf32>
    %cst_101 = arith.constant dense<0.000000e+00> : vector<8x8xf32>
    %261 = tpu.matmul %259, %260, %cst_101 {dimension_numbers = #tpu.dot_dimension_numbers<[1], [0], [0], [1], [0, 0, 1, 1], [], []>} : vector<8x16xf32>, vector<16x8xf32>, vector<8x8xf32> -> vector<8x8xf32>
    %262 = arith.addf %242, %259 : vector<8x16xf32>
    %263 = tpu.concatenate %202, %221, %241, %261 in 1 : vector<8x8xf32>, vector<8x8xf32>, vector<8x8xf32>, vector<8x8xf32> -> vector<8x32xf32>
    %cst_102 = arith.constant dense<0.000000e+00> : vector<8x32xf32>
    %264 = tpu.matmul %263, %167, %cst_102 {dimension_numbers = #tpu.dot_dimension_numbers<[1], [0], [0], [1], [0, 0, 1, 1], [], []>} : vector<8x32xf32>, vector<32x32xf32>, vector<8x32xf32> -> vector<8x32xf32>
    %265 = vector.broadcast %168 : vector<1x32xf32> to vector<8x32xf32>
    %266 = arith.addf %264, %265 : vector<8x32xf32>
    %cst_103 = arith.constant 2.500000e-01 : f32
    %267 = vector.broadcast %cst_103 : f32 to vector<8x16xf32>
    %268 = arith.mulf %262, %267 : vector<8x16xf32>
    %269 = arith.addf %162, %266 : vector<8x32xf32>
    %c0_104 = arith.constant 0 : index
    %c0_105 = arith.constant 0 : index
    %270 = vector.load %arg25[%c0_104, %c0_105] : memref<1x32xf32, #tpu.memory_space<vmem>>, vector<1x32xf32>
    %c0_106 = arith.constant 0 : index
    %c0_107 = arith.constant 0 : index
    %271 = vector.load %arg26[%c0_106, %c0_107] : memref<1x32xf32, #tpu.memory_space<vmem>>, vector<1x32xf32>
    %cst_108 = arith.constant dense<0.000000e+00> : vector<8xf32>
    %272 = vector.multi_reduction <add>, %269, %cst_108 [1] : vector<8x32xf32> to vector<8xf32>
    %273 = vector.shape_cast %272 : vector<8xf32> to vector<8x1xf32>
    %cst_109 = arith.constant 3.200000e+01 : f32
    %274 = vector.broadcast %cst_109 : f32 to vector<8x1xf32>
    %275 = arith.divf %273, %274 : vector<8x1xf32>
    %276 = vector.broadcast %275 : vector<8x1xf32> to vector<8x32xf32>
    %277 = arith.subf %269, %276 : vector<8x32xf32>
    %278 = vector.broadcast %275 : vector<8x1xf32> to vector<8x32xf32>
    %279 = arith.subf %269, %278 : vector<8x32xf32>
    %280 = arith.mulf %277, %279 : vector<8x32xf32>
    %cst_110 = arith.constant dense<0.000000e+00> : vector<8xf32>
    %281 = vector.multi_reduction <add>, %280, %cst_110 [1] : vector<8x32xf32> to vector<8xf32>
    %282 = vector.shape_cast %281 : vector<8xf32> to vector<8x1xf32>
    %cst_111 = arith.constant 3.200000e+01 : f32
    %283 = vector.broadcast %cst_111 : f32 to vector<8x1xf32>
    %284 = arith.divf %282, %283 : vector<8x1xf32>
    %285 = vector.broadcast %275 : vector<8x1xf32> to vector<8x32xf32>
    %286 = arith.subf %269, %285 : vector<8x32xf32>
    %cst_112 = arith.constant 9.99999974E-6 : f32
    %287 = vector.broadcast %cst_112 : f32 to vector<8x1xf32>
    %288 = arith.addf %284, %287 : vector<8x1xf32>
    %289 = math.rsqrt %288 : vector<8x1xf32>
    %290 = vector.broadcast %289 : vector<8x1xf32> to vector<8x32xf32>
    %291 = arith.mulf %286, %290 : vector<8x32xf32>
    %292 = vector.broadcast %270 : vector<1x32xf32> to vector<8x32xf32>
    %293 = arith.mulf %291, %292 : vector<8x32xf32>
    %294 = vector.broadcast %271 : vector<1x32xf32> to vector<8x32xf32>
    %295 = arith.addf %293, %294 : vector<8x32xf32>
    %c0_113 = arith.constant 0 : index
    %c0_114 = arith.constant 0 : index
    %296 = vector.load %arg19[%c0_113, %c0_114] : memref<32x64xf32, #tpu.memory_space<vmem>>, vector<32x64xf32>
    %cst_115 = arith.constant dense<0.000000e+00> : vector<8x64xf32>
    %297 = tpu.matmul %295, %296, %cst_115 {dimension_numbers = #tpu.dot_dimension_numbers<[1], [0], [0], [1], [0, 0, 1, 1], [], []>} : vector<8x32xf32>, vector<32x64xf32>, vector<8x64xf32> -> vector<8x64xf32>
    %c0_116 = arith.constant 0 : index
    %c0_117 = arith.constant 0 : index
    %298 = vector.load %arg20[%c0_116, %c0_117] : memref<1x64xf32, #tpu.memory_space<vmem>>, vector<1x64xf32>
    %299 = vector.broadcast %298 : vector<1x64xf32> to vector<8x64xf32>
    %300 = arith.addf %297, %299 : vector<8x64xf32>
    %cst_118 = arith.constant 5.000000e-01 : f32
    %301 = vector.broadcast %cst_118 : f32 to vector<8x64xf32>
    %302 = arith.mulf %301, %300 : vector<8x64xf32>
    %cst_119 = arith.constant 4.471500e-02 : f32
    %303 = vector.broadcast %cst_119 : f32 to vector<8x64xf32>
    %304 = arith.mulf %303, %300 : vector<8x64xf32>
    %305 = arith.mulf %304, %300 : vector<8x64xf32>
    %306 = arith.mulf %305, %300 : vector<8x64xf32>
    %307 = arith.addf %300, %306 : vector<8x64xf32>
    %cst_120 = arith.constant 0.797884583 : f32
    %308 = vector.broadcast %cst_120 : f32 to vector<8x64xf32>
    %309 = arith.mulf %308, %307 : vector<8x64xf32>
    %310 = math.tanh %309 : vector<8x64xf32>
    %cst_121 = arith.constant 1.000000e+00 : f32
    %311 = vector.broadcast %cst_121 : f32 to vector<8x64xf32>
    %312 = arith.addf %311, %310 : vector<8x64xf32>
    %313 = arith.mulf %302, %312 : vector<8x64xf32>
    %c0_122 = arith.constant 0 : index
    %c0_123 = arith.constant 0 : index
    %314 = vector.load %arg21[%c0_122, %c0_123] : memref<64x32xf32, #tpu.memory_space<vmem>>, vector<64x32xf32>
    %cst_124 = arith.constant dense<0.000000e+00> : vector<8x32xf32>
    %315 = tpu.matmul %313, %314, %cst_124 {dimension_numbers = #tpu.dot_dimension_numbers<[1], [0], [0], [1], [0, 0, 1, 1], [], []>} : vector<8x64xf32>, vector<64x32xf32>, vector<8x32xf32> -> vector<8x32xf32>
    %c0_125 = arith.constant 0 : index
    %c0_126 = arith.constant 0 : index
    %316 = vector.load %arg22[%c0_125, %c0_126] : memref<1x32xf32, #tpu.memory_space<vmem>>, vector<1x32xf32>
    %317 = vector.broadcast %316 : vector<1x32xf32> to vector<8x32xf32>
    %318 = arith.addf %315, %317 : vector<8x32xf32>
    %319 = arith.addf %295, %318 : vector<8x32xf32>
    %c0_127 = arith.constant 0 : index
    %c0_128 = arith.constant 0 : index
    %320 = vector.load %arg27[%c0_127, %c0_128] : memref<1x32xf32, #tpu.memory_space<vmem>>, vector<1x32xf32>
    %c0_129 = arith.constant 0 : index
    %c0_130 = arith.constant 0 : index
    %321 = vector.load %arg28[%c0_129, %c0_130] : memref<1x32xf32, #tpu.memory_space<vmem>>, vector<1x32xf32>
    %cst_131 = arith.constant dense<0.000000e+00> : vector<8xf32>
    %322 = vector.multi_reduction <add>, %319, %cst_131 [1] : vector<8x32xf32> to vector<8xf32>
    %323 = vector.shape_cast %322 : vector<8xf32> to vector<8x1xf32>
    %cst_132 = arith.constant 3.200000e+01 : f32
    %324 = vector.broadcast %cst_132 : f32 to vector<8x1xf32>
    %325 = arith.divf %323, %324 : vector<8x1xf32>
    %326 = vector.broadcast %325 : vector<8x1xf32> to vector<8x32xf32>
    %327 = arith.subf %319, %326 : vector<8x32xf32>
    %328 = vector.broadcast %325 : vector<8x1xf32> to vector<8x32xf32>
    %329 = arith.subf %319, %328 : vector<8x32xf32>
    %330 = arith.mulf %327, %329 : vector<8x32xf32>
    %cst_133 = arith.constant dense<0.000000e+00> : vector<8xf32>
    %331 = vector.multi_reduction <add>, %330, %cst_133 [1] : vector<8x32xf32> to vector<8xf32>
    %332 = vector.shape_cast %331 : vector<8xf32> to vector<8x1xf32>
    %cst_134 = arith.constant 3.200000e+01 : f32
    %333 = vector.broadcast %cst_134 : f32 to vector<8x1xf32>
    %334 = arith.divf %332, %333 : vector<8x1xf32>
    %335 = vector.broadcast %325 : vector<8x1xf32> to vector<8x32xf32>
    %336 = arith.subf %319, %335 : vector<8x32xf32>
    %cst_135 = arith.constant 9.99999974E-6 : f32
    %337 = vector.broadcast %cst_135 : f32 to vector<8x1xf32>
    %338 = arith.addf %334, %337 : vector<8x1xf32>
    %339 = math.rsqrt %338 : vector<8x1xf32>
    %340 = vector.broadcast %339 : vector<8x1xf32> to vector<8x32xf32>
    %341 = arith.mulf %336, %340 : vector<8x32xf32>
    %342 = vector.broadcast %320 : vector<1x32xf32> to vector<8x32xf32>
    %343 = arith.mulf %341, %342 : vector<8x32xf32>
    %344 = vector.broadcast %321 : vector<1x32xf32> to vector<8x32xf32>
    %345 = arith.addf %343, %344 : vector<8x32xf32>
    %c0_136 = arith.constant 0 : index
    %c0_137 = arith.constant 0 : index
    %c0_138 = arith.constant 0 : index
    %346 = vector.load %arg29[%c0_136, %c0_137, %c0_138] : memref<1x8x32xf32, #tpu.memory_space<vmem>>, vector<1x8x32xf32>
    %347 = vector.shape_cast %346 : vector<1x8x32xf32> to vector<8x32xf32>
    %348 = vector.shape_cast %345 : vector<8x32xf32> to vector<1x8x32xf32>
    tpu.vector_store %arg29[%c0_136, %c0_137, %c0_138], %348 {strides = array<i32>} : memref<1x8x32xf32, #tpu.memory_space<vmem>>, vector<1x8x32xf32>,
    %c0_139 = arith.constant 0 : index
    %c0_140 = arith.constant 0 : index
    %c0_141 = arith.constant 0 : index
    %349 = vector.load %arg30[%c0_139, %c0_140, %c0_141] : memref<1x8x16xf32, #tpu.memory_space<vmem>>, vector<1x8x16xf32>
    %350 = vector.shape_cast %349 : vector<1x8x16xf32> to vector<8x16xf32>
    %351 = vector.shape_cast %268 : vector<8x16xf32> to vector<1x8x16xf32>
    tpu.vector_store %arg30[%c0_139, %c0_140, %c0_141], %351 {strides = array<i32>} : memref<1x8x16xf32, #tpu.memory_space<vmem>>, vector<1x8x16xf32>,
    return
  }
  func.func @transform_0(%arg0: i32) -> (i32, i32, i32) {
    %c0_i32 = arith.constant 0 : i32
    %c0_i32_0 = arith.constant 0 : i32
    %c0_i32_1 = arith.constant 0 : i32
    return %arg0, %c0_i32, %c0_i32_0 : i32, i32, i32
  }
  func.func @transform_1(%arg0: i32) -> (i32, i32, i32) {
    %c0_i32 = arith.constant 0 : i32
    %c0_i32_0 = arith.constant 0 : i32
    %c0_i32_1 = arith.constant 0 : i32
    return %arg0, %c0_i32, %c0_i32_0 : i32, i32, i32
  }
  func.func @transform_2(%arg0: i32) -> (i32, i32, i32) {
    %c0_i32 = arith.constant 0 : i32
    %c0_i32_0 = arith.constant 0 : i32
    %c0_i32_1 = arith.constant 0 : i32
    return %arg0, %c0_i32, %c0_i32_0 : i32, i32, i32
  }
  func.func @transform_3(%arg0: i32) -> (i32, i32, i32) {
    %c0_i32 = arith.constant 0 : i32
    %c0_i32_0 = arith.constant 0 : i32
    %c0_i32_1 = arith.constant 0 : i32
    return %arg0, %c0_i32, %c0_i32_0 : i32, i32, i32
  }
  func.func @transform_4(%arg0: i32) -> (i32, i32, i32) {
    %c0_i32 = arith.constant 0 : i32
    %c0_i32_0 = arith.constant 0 : i32
    %c0_i32_1 = arith.constant 0 : i32
    return %arg0, %c0_i32, %c0_i32_0 : i32, i32, i32
  }
  func.func @transform_5(%arg0: i32) -> (i32, i32, i32) {
    %c0_i32 = arith.constant 0 : i32
    %c0_i32_0 = arith.constant 0 : i32
    %c0_i32_1 = arith.constant 0 : i32
    return %arg0, %c0_i32, %c0_i32_0 : i32, i32, i32
  }
  func.func @transform_6(%arg0: i32) -> (i32, i32) {
    %c0_i32 = arith.constant 0 : i32
    %c0_i32_0 = arith.constant 0 : i32
    %c0_i32_1 = arith.constant 0 : i32
    return %c0_i32, %c0_i32_0 : i32, i32
  }
  func.func @transform_7(%arg0: i32) -> (i32, i32) {
    %c0_i32 = arith.constant 0 : i32
    %c0_i32_0 = arith.constant 0 : i32
    %c0_i32_1 = arith.constant 0 : i32
    return %c0_i32, %c0_i32_0 : i32, i32
  }
  func.func @transform_8(%arg0: i32) -> (i32, i32) {
    %c0_i32 = arith.constant 0 : i32
    %c0_i32_0 = arith.constant 0 : i32
    %c0_i32_1 = arith.constant 0 : i32
    return %c0_i32, %c0_i32_0 : i32, i32
  }
  func.func @transform_9(%arg0: i32) -> (i32, i32) {
    %c0_i32 = arith.constant 0 : i32
    %c0_i32_0 = arith.constant 0 : i32
    %c0_i32_1 = arith.constant 0 : i32
    return %c0_i32, %c0_i32_0 : i32, i32
  }
  func.func @transform_10(%arg0: i32) -> (i32, i32) {
    %c0_i32 = arith.constant 0 : i32
    %c0_i32_0 = arith.constant 0 : i32
    %c0_i32_1 = arith.constant 0 : i32
    return %c0_i32, %c0_i32_0 : i32, i32
  }
  func.func @transform_11(%arg0: i32) -> (i32, i32) {
    %c0_i32 = arith.constant 0 : i32
    %c0_i32_0 = arith.constant 0 : i32
    %c0_i32_1 = arith.constant 0 : i32
    return %c0_i32, %c0_i32_0 : i32, i32
  }
  func.func @transform_12(%arg0: i32) -> (i32, i32) {
    %c0_i32 = arith.constant 0 : i32
    %c0_i32_0 = arith.constant 0 : i32
    %c0_i32_1 = arith.constant 0 : i32
    return %c0_i32, %c0_i32_0 : i32, i32
  }
  func.func @transform_13(%arg0: i32) -> (i32, i32) {
    %c0_i32 = arith.constant 0 : i32
    %c0_i32_0 = arith.constant 0 : i32
    %c0_i32_1 = arith.constant 0 : i32
    return %c0_i32, %c0_i32_0 : i32, i32
  }
  func.func @transform_14(%arg0: i32) -> (i32, i32) {
    %c0_i32 = arith.constant 0 : i32
    %c0_i32_0 = arith.constant 0 : i32
    %c0_i32_1 = arith.constant 0 : i32
    return %c0_i32, %c0_i32_0 : i32, i32
  }
  func.func @transform_15(%arg0: i32) -> (i32, i32) {
    %c0_i32 = arith.constant 0 : i32
    %c0_i32_0 = arith.constant 0 : i32
    %c0_i32_1 = arith.constant 0 : i32
    return %c0_i32, %c0_i32_0 : i32, i32
  }
  func.func @transform_16(%arg0: i32) -> (i32, i32) {
    %c0_i32 = arith.constant 0 : i32
    %c0_i32_0 = arith.constant 0 : i32
    %c0_i32_1 = arith.constant 0 : i32
    return %c0_i32, %c0_i32_0 : i32, i32
  }
  func.func @transform_17(%arg0: i32) -> (i32, i32) {
    %c0_i32 = arith.constant 0 : i32
    %c0_i32_0 = arith.constant 0 : i32
    %c0_i32_1 = arith.constant 0 : i32
    return %c0_i32, %c0_i32_0 : i32, i32
  }
  func.func @transform_18(%arg0: i32) -> (i32, i32) {
    %c0_i32 = arith.constant 0 : i32
    %c0_i32_0 = arith.constant 0 : i32
    %c0_i32_1 = arith.constant 0 : i32
    return %c0_i32, %c0_i32_0 : i32, i32
  }
  func.func @transform_19(%arg0: i32) -> (i32, i32) {
    %c0_i32 = arith.constant 0 : i32
    %c0_i32_0 = arith.constant 0 : i32
    %c0_i32_1 = arith.constant 0 : i32
    return %c0_i32, %c0_i32_0 : i32, i32
  }
  func.func @transform_20(%arg0: i32) -> (i32, i32) {
    %c0_i32 = arith.constant 0 : i32
    %c0_i32_0 = arith.constant 0 : i32
    %c0_i32_1 = arith.constant 0 : i32
    return %c0_i32, %c0_i32_0 : i32, i32
  }
  func.func @transform_21(%arg0: i32) -> (i32, i32) {
    %c0_i32 = arith.constant 0 : i32
    %c0_i32_0 = arith.constant 0 : i32
    %c0_i32_1 = arith.constant 0 : i32
    return %c0_i32, %c0_i32_0 : i32, i32
  }
  func.func @transform_22(%arg0: i32) -> (i32, i32) {
    %c0_i32 = arith.constant 0 : i32
    %c0_i32_0 = arith.constant 0 : i32
    %c0_i32_1 = arith.constant 0 : i32
    return %c0_i32, %c0_i32_0 : i32, i32
  }
  func.func @transform_23(%arg0: i32) -> (i32, i32) {
    %c0_i32 = arith.constant 0 : i32
    %c0_i32_0 = arith.constant 0 : i32
    %c0_i32_1 = arith.constant 0 : i32
    return %c0_i32, %c0_i32_0 : i32, i32
  }
  func.func @transform_24(%arg0: i32) -> (i32, i32) {
    %c0_i32 = arith.constant 0 : i32
    %c0_i32_0 = arith.constant 0 : i32
    %c0_i32_1 = arith.constant 0 : i32
    return %c0_i32, %c0_i32_0 : i32, i32
  }
  func.func @transform_25(%arg0: i32) -> (i32, i32) {
    %c0_i32 = arith.constant 0 : i32
    %c0_i32_0 = arith.constant 0 : i32
    %c0_i32_1 = arith.constant 0 : i32
    return %c0_i32, %c0_i32_0 : i32, i32
  }
  func.func @transform_26(%arg0: i32) -> (i32, i32) {
    %c0_i32 = arith.constant 0 : i32
    %c0_i32_0 = arith.constant 0 : i32
    %c0_i32_1 = arith.constant 0 : i32
    return %c0_i32, %c0_i32_0 : i32, i32
  }
  func.func @transform_27(%arg0: i32) -> (i32, i32) {
    %c0_i32 = arith.constant 0 : i32
    %c0_i32_0 = arith.constant 0 : i32
    %c0_i32_1 = arith.constant 0 : i32
    return %c0_i32, %c0_i32_0 : i32, i32
  }
  func.func @transform_28(%arg0: i32) -> (i32, i32, i32) {
    %c0_i32 = arith.constant 0 : i32
    %c0_i32_0 = arith.constant 0 : i32
    %c0_i32_1 = arith.constant 0 : i32
    return %arg0, %c0_i32, %c0_i32_0 : i32, i32, i32
  }
  func.func @transform_29(%arg0: i32) -> (i32, i32, i32) {
    %c0_i32 = arith.constant 0 : i32
    %c0_i32_0 = arith.constant 0 : i32
    %c0_i32_1 = arith.constant 0 : i32
    return %arg0, %c0_i32, %c0_i32_0 : i32, i32, i32
  }
}

module attributes {stable_mosaic.version = 11 : i64} {
  func.func @_layernorm_kernel(%arg0: i32, %arg1: memref<16x32xf32, #tpu.memory_space<vmem>>, %arg2: memref<1x32xf32, #tpu.memory_space<vmem>>, %arg3: memref<1x32xf32, #tpu.memory_space<vmem>>, %arg4: memref<16x32xf32, #tpu.memory_space<vmem>>) attributes {dimension_semantics = [#tpu.dimension_semantics<arbitrary>], iteration_bounds = array<i64: 1>, scalar_prefetch = 0 : i64, scratch_operands = 0 : i64, tpu.core_type = #tpu.core_type<tc>, window_params = [{pipeline_mode = #tpu.pipeline_mode<synchronous>, transform_indices = @transform_0, window_bounds = array<i64: 16, 32>}, {pipeline_mode = #tpu.pipeline_mode<synchronous>, transform_indices = @transform_1, window_bounds = array<i64: 1, 32>}, {pipeline_mode = #tpu.pipeline_mode<synchronous>, transform_indices = @transform_2, window_bounds = array<i64: 1, 32>}, {pipeline_mode = #tpu.pipeline_mode<synchronous>, transform_indices = @transform_3, window_bounds = array<i64: 16, 32>}]} {
    %c0 = arith.constant 0 : index
    %c0_0 = arith.constant 0 : index
    %0 = vector.load %arg1[%c0, %c0_0] : memref<16x32xf32, #tpu.memory_space<vmem>>, vector<16x32xf32>
    %c0_1 = arith.constant 0 : index
    %c0_2 = arith.constant 0 : index
    %1 = vector.load %arg2[%c0_1, %c0_2] : memref<1x32xf32, #tpu.memory_space<vmem>>, vector<1x32xf32>
    %c0_3 = arith.constant 0 : index
    %c0_4 = arith.constant 0 : index
    %2 = vector.load %arg3[%c0_3, %c0_4] : memref<1x32xf32, #tpu.memory_space<vmem>>, vector<1x32xf32>
    %cst = arith.constant dense<0.000000e+00> : vector<16xf32>
    %3 = vector.multi_reduction <add>, %0, %cst [1] : vector<16x32xf32> to vector<16xf32>
    %4 = vector.shape_cast %3 : vector<16xf32> to vector<16x1xf32>
    %cst_5 = arith.constant 3.200000e+01 : f32
    %5 = vector.broadcast %cst_5 : f32 to vector<16x1xf32>
    %6 = arith.divf %4, %5 : vector<16x1xf32>
    %7 = vector.broadcast %6 : vector<16x1xf32> to vector<16x32xf32>
    %8 = arith.subf %0, %7 : vector<16x32xf32>
    %9 = vector.broadcast %6 : vector<16x1xf32> to vector<16x32xf32>
    %10 = arith.subf %0, %9 : vector<16x32xf32>
    %11 = arith.mulf %8, %10 : vector<16x32xf32>
    %cst_6 = arith.constant dense<0.000000e+00> : vector<16xf32>
    %12 = vector.multi_reduction <add>, %11, %cst_6 [1] : vector<16x32xf32> to vector<16xf32>
    %13 = vector.shape_cast %12 : vector<16xf32> to vector<16x1xf32>
    %cst_7 = arith.constant 3.200000e+01 : f32
    %14 = vector.broadcast %cst_7 : f32 to vector<16x1xf32>
    %15 = arith.divf %13, %14 : vector<16x1xf32>
    %16 = vector.broadcast %6 : vector<16x1xf32> to vector<16x32xf32>
    %17 = arith.subf %0, %16 : vector<16x32xf32>
    %cst_8 = arith.constant 9.99999974E-6 : f32
    %18 = vector.broadcast %cst_8 : f32 to vector<16x1xf32>
    %19 = arith.addf %15, %18 : vector<16x1xf32>
    %20 = math.rsqrt %19 : vector<16x1xf32>
    %21 = vector.broadcast %20 : vector<16x1xf32> to vector<16x32xf32>
    %22 = arith.mulf %17, %21 : vector<16x32xf32>
    %23 = vector.broadcast %1 : vector<1x32xf32> to vector<16x32xf32>
    %24 = arith.mulf %22, %23 : vector<16x32xf32>
    %25 = vector.broadcast %2 : vector<1x32xf32> to vector<16x32xf32>
    %26 = arith.addf %24, %25 : vector<16x32xf32>
    %c0_9 = arith.constant 0 : index
    %c0_10 = arith.constant 0 : index
    %27 = vector.load %arg4[%c0_9, %c0_10] : memref<16x32xf32, #tpu.memory_space<vmem>>, vector<16x32xf32>
    tpu.vector_store %arg4[%c0_9, %c0_10], %26 {strides = array<i32>} : memref<16x32xf32, #tpu.memory_space<vmem>>, vector<16x32xf32>,
    return
  }
  func.func @transform_0(%arg0: i32) -> (i32, i32) {
    %c0_i32 = arith.constant 0 : i32
    %c0_i32_0 = arith.constant 0 : i32
    %c0_i32_1 = arith.constant 0 : i32
    return %c0_i32, %c0_i32_0 : i32, i32
  }
  func.func @transform_1(%arg0: i32) -> (i32, i32) {
    %c0_i32 = arith.constant 0 : i32
    %c0_i32_0 = arith.constant 0 : i32
    %c0_i32_1 = arith.constant 0 : i32
    return %c0_i32, %c0_i32_0 : i32, i32
  }
  func.func @transform_2(%arg0: i32) -> (i32, i32) {
    %c0_i32 = arith.constant 0 : i32
    %c0_i32_0 = arith.constant 0 : i32
    %c0_i32_1 = arith.constant 0 : i32
    return %c0_i32, %c0_i32_0 : i32, i32
  }
  func.func @transform_3(%arg0: i32) -> (i32, i32) {
    %c0_i32 = arith.constant 0 : i32
    %c0_i32_0 = arith.constant 0 : i32
    %c0_i32_1 = arith.constant 0 : i32
    return %c0_i32, %c0_i32_0 : i32, i32
  }
}

</mosaic_0001>

<bundles_post_ra>
// kernel: transformer_decoder_forward.6
= control target key start
LH: loop header
LB: loop body
LE: loop exit
PB: predicated region body
PF: predicated region fallthrough
CT: control target
= control target key end

     0   :  { %vm42_vm0 = vcmask 261120   ;;  %vm378_vm1 = vcmask 15360   ;;  %s609_s2 = inlined_call_operand.vmem [shape: f32[32,32], index: 2, kind: input, shape index: {}]   ;;  %s610_s0 = inlined_call_operand.vmem [shape: f32[16,32], index: 0, kind: input, shape index: {}]   ;;  %s611_s4 = inlined_call_operand.vmem [shape: f32[32,32], index: 4, kind: input, shape index: {}]   ;;  %s612_s3 = inlined_call_operand.vmem [shape: f32[1,32], index: 3, kind: input, shape index: {}]   ;;  %s613_s6 = inlined_call_operand.vmem [shape: f32[32,2], index: 6, kind: input, shape index: {}]   ;;  %s614_s5 = inlined_call_operand.vmem [shape: f32[1,32], index: 5, kind: input, shape index: {}]   ;;  %s615_s1 = inlined_call_operand.vmem [shape: f32[16,2], index: 1, kind: input, shape index: {}]   ;;  %s616_s7 = inlined_call_operand.vmem [shape: f32[1,2], index: 7, kind: input, shape index: {}]   ;;  %s617_s8 = inlined_call_operand.vmem [shape: f32[16,2], index: 8, kind: output, shape index: {}]  }
   0x1   :  { %v31_v0 = vld [vmem:[%s609_s2] sm:$0xff]  ;;  %v32_v1 = vld [vmem:[%s609_s2 + $0x8] sm:$0xff]  ;;  %v33_v2 = vld [vmem:[%s609_s2 + $0x10] sm:$0xff] }
   0x2   :  { %v447_v3 = vpack.c.bf16 %v32_v1, %v31_v0  ;;  %v34_v4 = vld [vmem:[%s609_s2 + $0x18] sm:$0xff]  ;;  %v29_v5 = vld [vmem:[%s610_s0] sm:$0xff]  ;;  %v30_v7 = vld [vmem:[%s610_s0 + $0x8] sm:$0xff] }
   0x3   :  { %v451_v6 = vpack.c.bf16 %v34_v4, %v33_v2  ;;  %422 = vmatprep.mubr.msk.f32.mxu0 %vm42_vm0, %v29_v5  ;;  %v142_v8 = vld [vmem:[%s611_s4] sm:$0xff]  ;;  %v143_v9 = vld [vmem:[%s611_s4 + $0x8] sm:$0xff]  ;;  %v144_v10 = vld [vmem:[%s611_s4 + $0x10] sm:$0xff] }
   0x4   :  { %448 = vmatprep.subr.bf16.mxu0 %v447_v3  ;;  %v455_v11 = vpack.c.bf16 %v143_v9, %v142_v8  ;;  %v145_v12 = vld [vmem:[%s611_s4 + $0x18] sm:$0xff]  ;;  %v385_v14 = vld [vmem:[%s612_s3] ss:$0 sm:$0xff]  ;;  %v253_v38 = vld [vmem:[%s613_s6 + $0x8] sm:$0xff] }
   0x5   :  { %450 = vmatpush3.bf16.msra.mxu0 %v447_v3  ;;  %v459_v13 = vpack.c.bf16 %v145_v12, %v144_v10  ;;  %v252_v37 = vld [vmem:[%s613_s6] sm:$0xff]  ;;  %v254_v39 = vld [vmem:[%s613_s6 + $0x10] sm:$0xff]  ;;  %v255_v41 = vld [vmem:[%s613_s6 + $0x18] sm:$0xff] }
   0x6   :  { %452 = vmatprep.subr.bf16.mxu0 %v451_v6  ;;  %456 = vmatprep.subr.bf16.mxu1 %v455_v11  ;;  %v463_v40 = vpack.c.bf16 %v253_v38, %v252_v37  ;;  %v467_v42 = vpack.c.bf16 %v255_v41, %v254_v39  ;;  %v388_v43 = vld [vmem:[%s614_s5] ss:$0 sm:$0xff]  ;;  %v345_v2 = vld [vmem:[%s615_s1 + $0x8] sm:$0xff] }
   0x7   :  { %458 = vmatpush3.bf16.msra.mxu1 %v455_v11  ;;  %v344_v3 = vld [vmem:[%s615_s1] sm:$0xff]  ;;  %v347_v4 = vmax.f32 %v345_v2, 0.0 }
   0x8   :  { %460 = vmatprep.subr.bf16.mxu1 %v459_v13  ;;  %v346_v5 = vmax.f32 %v344_v3, 0.0 }
   0x9   :  { %454 = vmatpush3.bf16.msra.mxu0 %v451_v6  ;;  %v349_v6 = vmin.f32 %v347_v4, 1.0 }
   0xa   :  { %464 = vmatprep.subr.bf16.mxu0 %v463_v40 }
   0xb   :  { %462 = vmatpush3.bf16.msra.mxu1 %v459_v13  ;;  %v353_v8 = vsub.f32 1.0, %v349_v6  ;;  %v351_v12 = vmax.f32 %v349_v6, 0.001 }
   0xc   :  { %423 = vmatmul.mubr.msk.f32.vlgmr.msra.gmra.mrb[0].mxu0 %vm42_vm0, %v30_v7  ;;  %v348_v7 = vmin.f32 %v346_v5, 1.0 }
   0xd   :  { %466 = vmatpush3.bf16.msra.mxu0 %v463_v40  ;;  %v355_v10 = vmax.f32 %v353_v8, 0.001 }
   0xe   :  { %468 = vmatprep.subr.bf16.mxu0 %v467_v42  ;;  %v352_v9 = vsub.f32 1.0, %v348_v7 }
  0x10   :  { %v354_v11 = vmax.f32 %v352_v9, 0.001 }
  0x11   :  { %470 = vmatpush3.bf16.msra.mxu0 %v467_v42 }
  0xdf   :  { %v424_v15 = vpop.f32.mrb[0].mxu0 }
  0xe0   :  { %v121_v16 = vadd.f32 %v424_v15, %v385_v14  ;;  %v115_v17 = vpop.f32.mrb[1].mxu0 }
  0xe1   :  { %v116_v18 = vadd.f32 %v385_v14, %v115_v17  ;;  %v350_v14 = vmax.f32 %v348_v7, 0.001 }
  0xe2   :  { %v127_v19 = vmul.f32 0.044715, %v121_v16  ;;  %v125_v34 = vmul.f32 0.5, %v121_v16 }
  0xe3   :  { %v126_v20 = vmul.f32 0.044715, %v116_v18  ;;  %v124_v32 = vmul.f32 0.5, %v116_v18 }
  0xe4   :  { %v129_v21 = vmul.f32 %v127_v19, %v121_v16 }
  0xe5   :  { %v128_v22 = vmul.f32 %v126_v20, %v116_v18  ;;  %v391_v20 = vld [vmem:[%s616_s7] ss:$0 sm:$0xff] }
  0xe6   :  { %v131_v23 = vmul.f32 %v129_v21, %v121_v16 }
  0xe7   :  { %v130_v24 = vmul.f32 %v128_v22, %v116_v18 }
  0xe8   :  { %v133_v25 = vadd.f32 %v131_v23, %v121_v16 }
  0xe9   :  { %v132_v26 = vadd.f32 %v130_v24, %v116_v18 }
  0xea   :  { %v135_v27 = vmul.f32 0.7978846, %v133_v25 }
  0xeb   :  { %v134_v28 = vmul.f32 0.7978846, %v132_v26 }
  0xec   :  { %471 = vtanh.f32 %v135_v27 }
  0xed   :  { %473 = vtanh.f32 %v134_v28 }
  0xf6   :  { %v472_v29 = vpop.eup %471 }
  0xf7   :  { %v474_v30 = vpop.eup %473  ;;  %v139_v31 = vadd.f32 1.0, %v472_v29 }
  0xf8   :  { %v138_v33 = vadd.f32 1.0, %v474_v30 }
  0xf9   :  { %v141_v36 = vmul.f32 %v139_v31, %v125_v34 }
  0xfa   :  { %v140_v35 = vmul.f32 %v138_v33, %v124_v32 }
  0xfc   :  { %433 = vmatprep.mubr.msk.f32.mxu1 %vm42_vm0, %v140_v35 }
  0xfd   :  { %434 = vmatmul.mubr.msk.f32.vlgmr.msra.gmra.mrb[0].mxu1 %vm42_vm0, %v141_v36 }
 0x1d0   :  { %v435_v44 = vpop.f32.mrb[0].mxu1 }
 0x1d1   :  { %v231_v45 = vadd.f32 %v435_v44, %v388_v43  ;;  %v225_v46 = vpop.f32.mrb[1].mxu1 }
 0x1d2   :  { %v226_v47 = vadd.f32 %v388_v43, %v225_v46 }
 0x1d3   :  { %v237_v48 = vmul.f32 0.044715, %v231_v45  ;;  %v235_v63 = vmul.f32 0.5, %v231_v45 }
 0x1d4   :  { %v236_v49 = vmul.f32 0.044715, %v226_v47  ;;  %v234_v61 = vmul.f32 0.5, %v226_v47 }
 0x1d5   :  { %v239_v50 = vmul.f32 %v237_v48, %v231_v45 }
 0x1d6   :  { %v238_v51 = vmul.f32 %v236_v49, %v226_v47 }
 0x1d7   :  { %v241_v52 = vmul.f32 %v239_v50, %v231_v45 }
 0x1d8   :  { %v240_v53 = vmul.f32 %v238_v51, %v226_v47 }
 0x1d9   :  { %v243_v54 = vadd.f32 %v241_v52, %v231_v45 }
 0x1da   :  { %v242_v55 = vadd.f32 %v240_v53, %v226_v47 }
 0x1db   :  { %v245_v56 = vmul.f32 0.7978846, %v243_v54 }
 0x1dc   :  { %v244_v57 = vmul.f32 0.7978846, %v242_v55 }
 0x1dd   :  { %475 = vtanh.f32 %v245_v56 }
 0x1de   :  { %477 = vtanh.f32 %v244_v57 }
 0x1df   :  { %479 = vrcp.f32 %v355_v10 }
 0x1e0   :  { %481 = vrcp.f32 %v354_v11 }
 0x1e7   :  { %v476_v58 = vpop.eup %475 }
 0x1e8   :  { %v478_v59 = vpop.eup %477  ;;  %v249_v60 = vadd.f32 1.0, %v476_v58 }
 0x1e9   :  { %v248_v62 = vadd.f32 1.0, %v478_v59  ;;  %v480_v13 = vpop.eup %479 }
 0x1ea   :  { %v251_v1 = vmul.f32 %v249_v60, %v235_v63  ;;  %v482_v15 = vpop.eup %481  ;;  %v359_v16 = vmul.f32 %v480_v13, %v351_v12 }
 0x1eb   :  { %v250_v0 = vmul.f32 %v248_v62, %v234_v61  ;;  %v357_v17 = vmul.f32 %v482_v15, %v350_v14 }
 0x1ec   :  { %483 = vlog2.f32 %v359_v16 }
 0x1ed   :  { %444 = vmatprep.mubr.msk.f32.mxu0 %vm42_vm0, %v250_v0  ;;  %485 = vlog2.f32 %v357_v17 }
 0x1ee   :  { %445 = vmatmul.mubr.msk.f32.vlgmr.msra.gmra.mrb[2].mxu0 %vm42_vm0, %v251_v1 }
 0x1f6   :  { %v484_v18 = vpop.eup %483 }
 0x1f7   :  { %v486_v19 = vpop.eup %485  ;;  %v363_v21 = vmul.f32 0.6931472, %v484_v18 }
 0x1f8   :  { %v361_v23 = vmul.f32 0.6931472, %v486_v19 }
 0x2c1   :  { %v446_v22 = vpop.f32.mrb[2].mxu0 }
 0x2c2   :  { %v341_v24 = vadd.f32 %v446_v22, %v391_v20  ;;  %v335_v25 = vpop.f32.mrb[3].mxu0 }
 0x2c3   :  { %v336_v26 = vadd.f32 %v391_v20, %v335_v25 }
 0x2c4   :  { %v365_v27 = vadd.f32 %v363_v21, %v341_v24 }
 0x2c5   :  { %v364_v28 = vadd.f32 %v361_v23, %v336_v26 }
 0x2c6   :  { %v395_v29 = vmul.f32 -1.442695, %v365_v27 }
 0x2c7   :  { %v394_v30 = vmul.f32 -1.442695, %v364_v28 }
 0x2c8   :  { %487 = vpow2.f32 %v395_v29 }
 0x2c9   :  { %489 = vpow2.f32 %v394_v30 }
 0x2d2   :  { %v488_v31 = vpop.eup %487 }
 0x2d3   :  { %v490_v32 = vpop.eup %489  ;;  %v373_v33 = vadd.f32 1.0, %v488_v31 }
 0x2d4   :  { %v372_v34 = vadd.f32 1.0, %v490_v32 }
 0x2d5   :  { %491 = vrcp.f32 %v373_v33 }
 0x2d6   :  { %493 = vrcp.f32 %v372_v34 }
 0x2df   :  { %v492_v35 = vpop.eup %491 }
 0x2e0   :  { %v494_v36 = vpop.eup %493  ;;  %380 = vst.msk [vmem:[%s617_s8 + $0x8] sm:$0xff] %vm378_vm1, %v492_v35 }
 0x2e1   :  { %379 = vst.msk [vmem:[%s617_s8] sm:$0xff] %vm378_vm1, %v494_v36 }

// kernel: transformer_decoder_forward.9
= control target key start
LH: loop header
LB: loop body
LE: loop exit
PB: predicated region body
PF: predicated region fallthrough
CT: control target
= control target key end

     0   :  { %vm18_vm0 = vcmask 261120   ;;  %s118_s0 = inlined_call_operand.vmem [shape: f32[16,32], index: 0, kind: input, shape index: {}]   ;;  %s119_s1 = inlined_call_operand.vmem [shape: f32[1,32], index: 1, kind: input, shape index: {}]   ;;  %s120_s2 = inlined_call_operand.vmem [shape: f32[1,32], index: 2, kind: input, shape index: {}]   ;;  %s121_s3 = inlined_call_operand.vmem [shape: f32[16,32], index: 3, kind: output, shape index: {}]  }
   0x1   :  { %v14_v0 = vld [vmem:[%s118_s0] sm:$0xff]  ;;  %v15_v1 = vld [vmem:[%s118_s0 + $0x8] sm:$0xff] }
   0x2   :  { %v19_v2 = vsel %vm18_vm0, %v14_v0, 0.0  ;;  %v22_v3 = vsel %vm18_vm0, %v15_v1, 0.0  ;;  %v68_v21 = vld [vmem:[%s119_s1] ss:$0 sm:$0xff] }
   0x3   :  { %20 = vadd.xlane.f32.xlu0 %v19_v2  ;;  %v69_v23 = vld [vmem:[%s120_s2] ss:$0 sm:$0xff] }
   0x7   :  { %23 = vadd.xlane.f32.xlu0 %v22_v3 }
  0x90   :  { %v21_v4 = vpop.xlane.xlu0 %20 }
  0x91   :  { %v26_v5 = vmul.f32 0.03125, %v21_v4 }
  0x93   :  { %v28_v6 = vsub.f32 %v14_v0, %v26_v5 }
  0x94   :  { %v24_v7 = vpop.xlane.xlu0 %23 }
  0x95   :  { %v27_v8 = vmul.f32 0.03125, %v24_v7  ;;  %v30_v9 = vmul.f32 %v28_v6, %v28_v6 }
  0x97   :  { %v29_v10 = vsub.f32 %v15_v1, %v27_v8  ;;  %v32_v11 = vsel %vm18_vm0, %v30_v9, 0.0 }
  0x98   :  { %33 = vadd.xlane.f32.xlu1 %v32_v11 }
  0x99   :  { %v31_v12 = vmul.f32 %v29_v10, %v29_v10 }
  0x9b   :  { %v35_v13 = vsel %vm18_vm0, %v31_v12, 0.0 }
  0x9c   :  { %36 = vadd.xlane.f32.xlu1 %v35_v13 }
 0x125   :  { %v34_v14 = vpop.xlane.xlu1 %33 }
 0x126   :  { %v38_v15 = vmul.f32 0.03125, %v34_v14 }
 0x128   :  { %v40_v16 = vadd.f32 1e-05, %v38_v15 }
 0x129   :  { %v37_v17 = vpop.xlane.xlu1 %36 }
 0x12a   :  { %70 = vrsqrt.f32 %v40_v16  ;;  %v39_v18 = vmul.f32 0.03125, %v37_v17 }
 0x12c   :  { %v41_v19 = vadd.f32 1e-05, %v39_v18 }
 0x12e   :  { %72 = vrsqrt.f32 %v41_v19 }
 0x134   :  { %v71_v20 = vpop.eup %70 }
 0x135   :  { %v44_v22 = vmul.f32 %v71_v20, %v28_v6 }
 0x137   :  { %v52_v24 = vmul.f32 %v68_v21, %v44_v22 }
 0x138   :  { %v73_v25 = vpop.eup %72 }
 0x139   :  { %v60_v26 = vadd.f32 %v69_v23, %v52_v24  ;;  %v45_v27 = vmul.f32 %v73_v25, %v29_v10 }
 0x13b   :  { %62 = vst.msk [vmem:[%s121_s3] sm:$0xff] %vm18_vm0, %v60_v26  ;;  %v53_v28 = vmul.f32 %v68_v21, %v45_v27 }
 0x13d   :  { %v61_v29 = vadd.f32 %v69_v23, %v53_v28 }
 0x13f   :  { %63 = vst.msk [vmem:[%s121_s3 + $0x8] sm:$0xff] %vm18_vm0, %v61_v29 }

// kernel: transformer_decoder_forward.5
= control target key start
LH: loop header
LB: loop body
LE: loop exit
PB: predicated region body
PF: predicated region fallthrough
CT: control target
= control target key end

     0   :  { %s4540_s6 = smov 1   ;;  %s4541_s10 = smov 2   ;;  %s5161_s0 = inlined_call_operand.smem [shape: u32[30], index: -1, kind: input, shape index: {}] }
   0x1   :  { %s4589_s5 = sld [smem:[%s5161_s0]]   ;;  %s4542_s14 = smov 3  }
   0x2   :  { %s4594_s9 = sld [smem:[%s5161_s0 + %s4540_s6]]   ;;  %s4543_s18 = smov 4  }
   0x3   :  { %s4599_s13 = sld [smem:[%s5161_s0 + %s4541_s10]]   ;;  %s4544_s22 = smov 5  }
   0x4   :  { %s4604_s17 = sld [smem:[%s5161_s0 + %s4542_s14]]   ;;  %s4545_s26 = smov 6  }
   0x5   :  { %s4609_s21 = sld [smem:[%s5161_s0 + %s4543_s18]]   ;;  %s4546_s30 = smov 7  }
   0x6   :  { %s4614_s25 = sld [smem:[%s5161_s0 + %s4544_s22]]   ;;  %s4547_s4 = smov 8  }
   0x7   :  { %5183 = sst [smem:[#allocation5_spill]] %s4589_s5  ;;  %s4548_s10 = smov 9  }
   0x8   :  { %5184 = sst [smem:[#allocation6_spill]] %s4594_s9  ;;  %s4549_s15 = smov 10  }
   0x9   :  { %5185 = sst [smem:[#allocation7_spill]] %s4599_s13  ;;  %s4550_s20 = smov 11  }
   0xa   :  { %s4619_s29 = sld [smem:[%s5161_s0 + %s4545_s26]]   ;;  %s4551_s26 = smov 12  }
   0xb   :  { %s4624_s3 = sld [smem:[%s5161_s0 + %s4546_s30]]   ;;  %s4552_s1 = smov 13  }
   0xc   :  { %5186 = sst [smem:[#allocation8_spill]] %s4614_s25  ;;  %s4553_s7 = smov 14  }
   0xd   :  { %s4629_s8 = sld [smem:[%s5161_s0 + %s4547_s4]]   ;;  %s4555_s22 = smov 16  }
   0xe   :  { %s4634_s14 = sld [smem:[%s5161_s0 + %s4548_s10]]   ;;  %s4556_s28 = smov 17  }
   0xf   :  { %s4639_s19 = sld [smem:[%s5161_s0 + %s4549_s15]]   ;;  %s4554_s15 = smov 15  }
  0x10   :  { %s4644_s24 = sld [smem:[%s5161_s0 + %s4550_s20]]  }
  0x11   :  { %5187 = sst [smem:[#allocation9_spill]] %s4624_s3 }
  0x12   :  { %s4649_s30 = sld [smem:[%s5161_s0 + %s4551_s26]]  }
  0x13   :  { %5188 = sst [smem:[#allocation10_spill]] %s4629_s8 }
  0x14   :  { %5189 = sst [smem:[#allocation11_spill]] %s4634_s14 }
  0x15   :  { %s4654_s6 = sld [smem:[%s5161_s0 + %s4552_s1]]  }
  0x16   :  { %s4659_s12 = sld [smem:[%s5161_s0 + %s4553_s7]]   ;;  %s4557_s7 = smov 18  }
  0x17   :  { %s4664_s20 = sld [smem:[%s5161_s0 + %s4554_s15]]   ;;  %s4558_s15 = smov 19  }
  0x18   :  { %s4669_s27 = sld [smem:[%s5161_s0 + %s4555_s22]]   ;;  %s4559_s22 = smov 20  }
  0x19   :  { %s4674_s4 = sld [smem:[%s5161_s0 + %s4556_s28]]   ;;  %s4560_s28 = smov 21  }
  0x1a   :  { %s4679_s25 = sld [smem:[%s5161_s0 + %s4557_s7]]   ;;  %s4561_s7 = smov 22  }
  0x1b   :  { %5190 = sst [smem:[#allocation12_spill]] %s4654_s6 }
  0x1c   :  { %5191 = sst [smem:[#allocation13_spill]] %s4659_s12 }
  0x1d   :  { %5192 = sst [smem:[#allocation14_spill]] %s4664_s20 }
  0x1e   :  { %5193 = sst [smem:[#allocation15_spill]] %s4669_s27 }
  0x1f   :  { %5194 = sst [smem:[#allocation16_spill]] %s4674_s4 }
  0x20   :  { %5195 = sst [smem:[#allocation17_spill]] %s4679_s25 }
  0x21   :  { %s4684_s20 = sld [smem:[%s5161_s0 + %s4558_s15]]   ;;  %s4562_s15 = smov 23  }
  0x22   :  { %s4689_s27 = sld [smem:[%s5161_s0 + %s4559_s22]]   ;;  %s4563_s22 = smov 24  }
  0x23   :  { %s4694_s4 = sld [smem:[%s5161_s0 + %s4560_s28]]   ;;  %s4564_s28 = smov 25  }
  0x24   :  { %s4699_s25 = sld [smem:[%s5161_s0 + %s4561_s7]]   ;;  %s4565_s7 = smov 26  }
  0x27   :  { %5196 = sst [smem:[#allocation18_spill]] %s4684_s20 }
  0x28   :  { %5197 = sst [smem:[#allocation19_spill]] %s4689_s27 }
  0x29   :  { %5198 = sst [smem:[#allocation20_spill]] %s4694_s4 }
  0x2a   :  { %5199 = sst [smem:[#allocation21_spill]] %s4699_s25 }
  0x2b   :  { %s4704_s20 = sld [smem:[%s5161_s0 + %s4562_s15]]   ;;  %s4566_s15 = smov 27  }
  0x2c   :  { %s4709_s27 = sld [smem:[%s5161_s0 + %s4563_s22]]   ;;  %s4567_s22 = smov 28  }
  0x2d   :  { %s4714_s4 = sld [smem:[%s5161_s0 + %s4564_s28]]   ;;  %s4568_s28 = smov 29  }
  0x2e   :  { %s4719_s25 = sld [smem:[%s5161_s0 + %s4565_s7]]  }
  0x31   :  { %5200 = sst [smem:[#allocation22_spill]] %s4704_s20 }
  0x32   :  { %5201 = sst [smem:[#allocation23_spill]] %s4709_s27 }
  0x33   :  { %5202 = sst [smem:[#allocation24_spill]] %s4714_s4 }
  0x34   :  { %s4724_s20 = sld [smem:[%s5161_s0 + %s4566_s15]]  }
  0x35   :  { %s4729_s27 = sld [smem:[%s5161_s0 + %s4567_s22]]  }
  0x36   :  { %s4734_s4 = sld [smem:[%s5161_s0 + %s4568_s28]]  }
  0x37   :  { %65 = vsyncpa [#allocation3], 0 }
  0x38   :  { %67 = vsyncpa [#allocation3 + $0x1], 0  ;;  %s4736_s7 = smov 0   ;;  %s4738_s10 = smov 0  }
  0x39   :  { %s4740_s11 = smov 0   ;;  %s4742_s15 = smov 0  }
  0x3a LB: > { %s5203_s12 = sld [smem:[#allocation13_spill]]  ;;  %s5204_s8 = sld [smem:[#allocation10_spill]]  ;;  %s4530_s10 = sphi %s4738_s10, %s5236_s10   ;;  %s4526_s7 = sphi %s4736_s7, %s5235_s7   ;;  %s4538_s15 = sphi %s4742_s15, %s5238_s15   ;;  %s4534_s11 = sphi %s4740_s11, %s5237_s11  }
  0x3b   : > { %s4757_s0 = sadd.s32 4294967295, %s4538_s15   ;;  %s3757_s16 = sadd.s32 4294967294, %s4538_s15  }
  0x3c   : > { %s4761_s18 = sadd.s32 1, %s4538_s15   ;;  %s724_s22 = sadd.s32 1, %s4534_s11 }
  0x3d   : > { %s721_s23 = ssub.s32 %s4538_s15, %s4761_s18  ;;  %p734_p0 = scmp.ne.s32.totalorder %s4534_s11, %s4530_s10 }
  0x3e   : > { %p722_p1 = scmp.eq.s32.totalorder %s721_s23, 0  ;;  %p735_p2 = scmp.eq.s32.totalorder %s4757_s0, 1 }
  0x3f   : > { %p740_p3 = scmp.ne.s32.totalorder %s4530_s10, %s4526_s7  ;;  %p741_p4 = scmp.eq.s32.totalorder %s3757_s16, 1 }
  0x40   : > { %s4772_s26 = scalar_select %p722_p1, %s4534_s11, %s724_s22  }
  0x41   : > { %p4774_p5 = por %p735_p2, %p734_p0  ;;  %p4778_p6 = por %p741_p4, %p740_p3 }
  0x42   : > { %p3760_p7 = scmp.ge.s32.totalorder %s4538_s15, 1  ;;  %p867_p8 = scmp.lt.s32.totalorder %s4538_s15, 3 }
  0x44   : > { %p868_p9 = pnand %p3760_p7, %p867_p8 }
  0x45   : > { %v1002_v0 = vld [vmem:[%s4619_s29] sm:$0xff] (!%p868_p9)  ;;  %v1003_v1 = vld [vmem:[%s4619_s29 + $0x8] sm:$0xff] (!%p868_p9)  ;;  %v1004_v2 = vld [vmem:[%s4619_s29 + $0x10] sm:$0xff] (!%p868_p9)  ;;  %v4569_v3 = vmov (!%p868_p9), 0.0|0.0   ;;  %vm4570_vm0 = vmmov (!%p868_p9), 0   ;;  %v4571_v6 = vmov (!%p868_p9), 0.0  }
  0x46   : > { %871 = sbr.rel (%p868_p9) target bundleno = 6256 (0x1870), region = 132  ;;  %4175 = vmatprep.subr.bf16.mxu1 (!%p868_p9), %v4569_v3  ;;  %v4176_v4 = vpack.c.bf16 (!%p868_p9), %v1003_v1, %v1002_v0  ;;  %v1005_v5 = vld [vmem:[%s4619_s29 + $0x18] sm:$0xff] (!%p868_p9)  ;;  %3947 = vmatprep.mubr.msk.f32.mxu1 (!%p868_p9), %vm4570_vm0, %v4571_v6  ;;  %p966_p10 = scmp.lt.s32.totalorder (!%p868_p9), %s4757_s0, 1  ;;  %vm1013_vm1 = vcmask (!%p868_p9), 261120   ;;  %v1096_v9 = vld [vmem:[%s5204_s8] sm:$0xff] (!%p868_p9)  ;;  %v1097_v10 = vld [vmem:[%s5204_s8 + $0x8] sm:$0xff] (!%p868_p9) }
  0x47   : > { %4187 = vmatprep.subr.bf16.mxu0 (!%p868_p9), %v4569_v3  ;;  %3969 = vmatprep.mubr.msk.f32.mxu0 (!%p868_p9), %vm4570_vm0, %v4571_v6  ;;  %v4179_v7 = vpack.c.bf16 (!%p868_p9), %v1005_v5, %v1004_v2  ;;  %v1098_v11 = vld [vmem:[%s5204_s8 + $0x10] sm:$0xff] (!%p868_p9)  ;;  %v4182_v12 = vpack.c.bf16 (!%p868_p9), %v1097_v10, %v1096_v9  ;;  %v1099_v13 = vld [vmem:[%s5204_s8 + $0x18] sm:$0xff] (!%p868_p9)  ;;  %s5207_s3 = sld [smem:[#allocation9_spill]] (!%p868_p9)  ;;  %v1181_v15 = vld [vmem:[%s4639_s19] sm:$0xff] (!%p868_p9)  ;;  %s5165_s23 = smov (!%p868_p9), 96   ;;  %vm1447_vm2 = vcmask (!%p868_p9), 64512  }
  0x48   : > { %4177 = vmatpush3.bf16.msra.mxu1 (!%p868_p9), %v4176_v4  ;;  %v4185_v14 = vpack.c.bf16 (!%p868_p9), %v1099_v13, %v1098_v11  ;;  %v1182_v16 = vld [vmem:[%s4639_s19 + $0x8] sm:$0xff] (!%p868_p9)  ;;  %v1183_v17 = vld [vmem:[%s4639_s19 + $0x10] sm:$0xff] (!%p868_p9)  ;;  %v1184_v19 = vld [vmem:[%s4639_s19 + $0x18] sm:$0xff] (!%p868_p9)  ;;  %s5208_s5 = sld [smem:[#allocation5_spill]] (!%p868_p9)  ;;  %s5209_s14 = sld [smem:[#allocation11_spill]] (!%p868_p9)  ;;  %vm2131_vm3 = vcmask (!%p868_p9), 130048  }
  0x49   : > { %4178 = vmatprep.subr.bf16.mxu1 (!%p868_p9), %v4569_v3  ;;  %v4364_v18 = vpack.i.bf16 (!%p868_p9), %v1182_v16, %v1181_v15  ;;  %v4188_v20 = vpack.c.bf16 (!%p868_p9), %v1182_v16, %v1181_v15  ;;  %v4369_v21 = vpack.i.bf16 (!%p868_p9), %v1184_v19, %v1183_v17  ;;  %v4191_v43 = vpack.c.bf16 (!%p868_p9), %v1184_v19, %v1183_v17  ;;  %v4829_v44 = vld [vmem:[%s4644_s24] ss:$0 sm:$0xff] (!%p868_p9)  ;;  %s5212_s6 = sld [smem:[#allocation12_spill]] (!%p868_p9)  ;;  %s5176_s8 = smov (!%p868_p9), 24   ;;  %vm4965_vm5 = vmpackc.low (!%p868_p9), %vm1447_vm2, %vm1447_vm2 }
  0x4a   : > { %1286 = vrot.lane.b32.xlu1 (!%p868_p9), %v4829_v44, %s5165_s23  ;;  %vm2133_vm4 = vcmask (!%p868_p9), 195584   ;;  %s5214_s9 = sld [smem:[#allocation6_spill]] (!%p868_p9)  ;;  %s5215_s13 = sld [smem:[#allocation7_spill]] (!%p868_p9)  ;;  %vm3464_vm6 = vcmask (!%p868_p9), 523264  }
  0x4b   : > { %4365 = vrot.lane.b32.xlu0 (!%p868_p9), %v4364_v18, %s5165_s23  ;;  %4189 = vmatpush3.bf16.msra.mxu0 (!%p868_p9), %v4188_v20 }
  0x4c   : > { %4180 = vmatpush3.bf16.msra.mxu1 (!%p868_p9), %v4179_v7  ;;  %4190 = vmatprep.subr.bf16.mxu0 (!%p868_p9), %v4569_v3 }
  0x4d   : > { %s4796_s2 = scalar_select %p966_p10, %s4757_s0, 1  ;;  %4181 = vmatprep.subr.bf16.mxu1 %v4569_v3  ;;  %v3769_v22 = vld [vmem:[%s5207_s3] ss:$0 sm:$0xff] }
  0x4e   : > { %v3771_v45 = vld [vmem:[%s5209_s14] ss:$0 sm:$0xff] }
  0x4f   : > { %s4800_s16 = sshll.u32 %s4796_s2, 3  ;;  %4370 = vrot.lane.b32.xlu0 %v4369_v21, %s5165_s23  ;;  %4192 = vmatpush3.bf16.msra.mxu0 %v4191_v43  ;;  %s5173_s23 = smov 112  }
  0x50   : > { %s983_s22 = scalar_lea.vmem %s4604_s17, %s4800_s16  ;;  %4199 = vmatprep.subr.bf16.mxu0 %v4569_v3  ;;  %s969_s3 = scalar_lea.vmem %s5208_s5, %s4800_s16 }
  0x51   : > { %v999_v8 = vld [vmem:[%s983_s22] sm:$0xff]  ;;  %s5167_s22 = smov 64   ;;  %s5211_s5 = smov 120  }
  0x52   : > { %3948 = vmatmul.mubr.msk.f32.vlgmr.msra.gmra.mrb[0].mxu1 %vm1013_vm1, %v999_v8  ;;  %4375 = vrot.lane.b32.xlu1 %v4364_v18, %s5167_s22  ;;  %v4838_v46 = vld [vmem:[%s969_s3] sm:$0xff]  ;;  %s5169_s3 = smov 120  }
  0x53   : > { %3958 = vmatprep.mubr.msk.f32.mxu1 %vm4570_vm0, %v4571_v6  ;;  %4183 = vmatpush3.bf16.msra.mxu1 %v4182_v12 }
  0x54   : > { %4184 = vmatprep.subr.bf16.mxu1 %v4569_v3  ;;  %4380 = vrot.lane.b32.xlu0 %v4369_v21, %s5167_s22  ;;  %s5171_s22 = smov 104  }
  0x57   : > { %4186 = vmatpush3.bf16.msra.mxu1 %v4185_v14 }
  0x58   : > { %4193 = vmatprep.subr.bf16.mxu1 %v4569_v3 }
  0xbc   : > { %v1287_v51 = vpop.permute.xlu1 %1286 }
  0xbd   : > { %v4366_v31 = vpop.permute.xlu0 %4365 }
  0xbe   : > { %v4368_v32 = vunpack.i.h.bf16 %v4366_v31  ;;  %v4367_v33 = vunpack.i.l.bf16 %v4366_v31 }
  0xc0   : > { %v4194_v38 = vpack.c.bf16 %v4368_v32, %v4367_v33 }
  0xc1   : > { %v4371_v34 = vpop.permute.xlu0 %4370 }
  0xc2   : > { %v4373_v39 = vunpack.i.h.bf16 %v4371_v34  ;;  %v4372_v40 = vunpack.i.l.bf16 %v4371_v34 }
  0xc4   : > { %v4197_v42 = vpack.c.bf16 %v4373_v39, %v4372_v40  ;;  %v4376_v52 = vpop.permute.xlu1 %4375 }
  0xc5   : > { %v4378_v54 = vunpack.i.h.bf16 %v4376_v52  ;;  %v4377_v55 = vunpack.i.l.bf16 %v4376_v52 }
  0xc6   : > { %v4381_v53 = vpop.permute.xlu0 %4380 }
  0xc7   : > { %v4383_v56 = vunpack.i.h.bf16 %v4381_v53  ;;  %v4382_v57 = vunpack.i.l.bf16 %v4381_v53  ;;  %v4200_v58 = vpack.c.bf16 %v4378_v54, %v4377_v55 }
  0xc9   : > { %v4203_v59 = vpack.c.bf16 %v4383_v56, %v4382_v57 }
 0x125   : > { %v1083_v23 = vpop.f32.mrb[0].mxu1 }
 0x126   : > { %v1084_v24 = vadd.f32 %v3769_v22, %v1083_v23  ;;  %v3949_v25 = vpop.f32.mrb[1].mxu1 }
 0x128   : > { %v1088_v26 = vmul.f32 0.044715, %v1084_v24  ;;  %v1087_v36 = vmul.f32 0.5, %v1084_v24 }
 0x12a   : > { %v1089_v27 = vmul.f32 %v1088_v26, %v1084_v24 }
 0x12c   : > { %v1090_v28 = vmul.f32 %v1089_v27, %v1084_v24 }
 0x12e   : > { %v1091_v29 = vadd.f32 %v1090_v28, %v1084_v24 }
 0x130   : > { %v1092_v30 = vmul.f32 0.7978846, %v1091_v29 }
 0x132   : > { %4434 = vtanh.f32 %v1092_v30 }
 0x13c   : > { %v4435_v35 = vpop.eup %4434 }
 0x13d   : > { %v1094_v37 = vadd.f32 1.0, %v4435_v35 }
 0x13f   : > { %v1095_v41 = vmul.f32 %v1094_v37, %v1087_v36 }
 0x141   : > { %3959 = vmatmul.mubr.msk.f32.vlgmr.msra.gmra.mrb[2].mxu1 %vm1013_vm1, %v1095_v41 }
 0x142   : > { %4195 = vmatpush3.bf16.msra.mxu1 %v4194_v38  ;;  %3980 = vmatprep.mubr.msk.f32.mxu1 %vm4570_vm0, %v4571_v6 }
 0x143   : > { %4196 = vmatprep.subr.bf16.mxu1 %v4569_v3 }
 0x146   : > { %4198 = vmatpush3.bf16.msra.mxu1 %v4197_v42 }
 0x147   : > { %3994 = vmatprep.subr.mxu1 %v4571_v6 }
 0x214   : > { %v1176_v47 = vpop.f32.mrb[2].mxu1 }
 0x215   : > { %v4840_v48 = vadd.f32 %v3771_v45, %v1176_v47  ;;  %v3960_v49 = vpop.f32.mrb[3].mxu1 }
 0x217   : > { %v1180_v50 = vadd.f32 %v4840_v48, %v4838_v46 }
 0x219   : > { %3970 = vmatmul.mubr.msk.f32.vlgmr.msra.gmra.mrb[0].mxu0 %vm1013_vm1, %v1180_v50  ;;  %3981 = vmatmul.mubr.msk.f32.vlgmr.msra.gmra.mrb[4].mxu1 %vm1013_vm1, %v1180_v50 }
 0x21a   : > { %3996 = vmatprep.mubr.msk.f32.mxu1 %vm4570_vm0, %v4571_v6  ;;  %3991 = vmatprep.mubr.msk.f32.mxu0 %vm4570_vm0, %v4571_v6 }
 0x21b   : > { %4201 = vmatpush3.bf16.msra.mxu0 %v4200_v58 }
 0x21c   : > { %4202 = vmatprep.subr.bf16.mxu0 %v4569_v3 }
 0x21f   : > { %4204 = vmatpush3.bf16.msra.mxu0 %v4203_v59 }
 0x220   : > { %4004 = vmatprep.subr.mxu0 %v4571_v6 }
 0x222   : > { %3992 = vmatmul.mubr.msk.f32.vlgmr.msra.gmra.mrb[2].mxu0 %vm1013_vm1, %v4838_v46 }
 0x223   : > { %4006 = vmatprep.mubr.msk.f32.mxu0 %vm4570_vm0, %v4571_v6 }
 0x2ec   : > { %v1266_v60 = vpop.f32.mrb[0].mxu0  ;;  %v1355_v61 = vpop.f32.mrb[4].mxu1 }
 0x2ed   : > { %v1267_v62 = vadd.f32 %v4829_v44, %v1266_v60  ;;  %v1356_v63 = vadd.f32 %v1355_v61, %v1287_v51  ;;  %v3971_v0 = vpop.f32.mrb[1].mxu0  ;;  %v3982_v1 = vpop.f32.mrb[5].mxu1 }
 0x2ef   : > { %1618 = vrot.lane.b32.xlu1 %v1356_v63, %s5169_s3  ;;  %3995 = vmatpush3.xpose.msk.msra.mxu1 %vm1447_vm2, %v1356_v63 }
 0x2f0   : > { %1616 = vrot.lane.b32.xlu0 %v1267_v62, %s5169_s3  ;;  %3999 = vmatprep.subr.mxu1 %v4571_v6  ;;  %s986_s3 = scalar_lea.vmem %s4609_s21, %s4796_s2 }
 0x2f1   : > { %v3779_v13 = vld [vmem:[%s986_s3] ss:$0 sm:$0xff]  ;;  %s5210_s3 = smov 64  }
 0x2f2   : > { %3997 = vmatmul.mubr.msk.f32.vlgmr.msra.gmra.mrb[6].mxu1 %vm1447_vm2, %v1267_v62 }
 0x2f3   : > { %1786 = vrot.lane.b32.xlu1 %v1356_v63, %s5173_s23  ;;  %4001 = vmatprep.mubr.msk.f32.mxu1 %vm4570_vm0, %v4571_v6 }
 0x2f4   : > { %1784 = vrot.lane.b32.xlu0 %v1267_v62, %s5173_s23 }
 0x2f5   : > { %v4868_v2 = vpop.f32.mrb[2].mxu0 }
 0x2f6   : > { %v3993_v4 = vpop.f32.mrb[3].mxu0 }
 0x2f7   : > { %1953 = vrot.lane.b32.xlu1 %v1356_v63, %s5171_s22 }
 0x2f8   : > { %1951 = vrot.lane.b32.xlu0 %v1267_v62, %s5171_s22 }
 0x361   : > { %v1619_v5 = vpop.permute.xlu1 %1618 }
 0x362   : > { %v1617_v7 = vpop.permute.xlu0 %1616  ;;  %4005 = vmatpush3.xpose.msk.msra.mxu0 %vm1447_vm2, %v1619_v5 }
 0x363   : > { %4014 = vmatprep.subr.mxu0 %v4571_v6 }
 0x365   : > { %v1787_v8 = vpop.permute.xlu1 %1786  ;;  %4007 = vmatmul.mubr.msk.f32.vlgmr.msra.gmra.mrb[4].mxu0 %vm1447_vm2, %v1617_v7 }
 0x366   : > { %v1785_v9 = vpop.permute.xlu0 %1784  ;;  %4015 = vmatpush3.xpose.msk.msra.mxu0 %vm1447_vm2, %v1787_v8  ;;  %4016 = vmatprep.mubr.msk.f32.mxu0 %vm4570_vm0, %v4571_v6 }
 0x367   : > { %4024 = vmatprep.subr.mxu0 %v4571_v6 }
 0x369   : > { %v1954_v10 = vpop.permute.xlu1 %1953  ;;  %4017 = vmatmul.mubr.msk.f32.vlgmr.msra.gmra.mrb[6].mxu0 %vm1447_vm2, %v1785_v9 }
 0x36a   : > { %4025 = vmatpush3.xpose.msk.msra.mxu0 %vm1447_vm2, %v1954_v10  ;;  %4026 = vmatprep.mubr.msk.f32.mxu0 %vm4570_vm0, %v4571_v6  ;;  %v1952_v11 = vpop.permute.xlu0 %1951 }
 0x36b   : > { %4205 = vmatprep.subr.bf16.mxu0 %v4569_v3 }
 0x36d   : > { %4027 = vmatmul.mubr.msk.f32.vlgmr.msra.gmra.mrb[8].mxu0 %vm1447_vm2, %v1952_v11 }
 0x36e   : > { %4042 = vmatprep.mubr.msk.f32.mxu0 %vm4570_vm0, %v4571_v6 }
 0x3c5   : > { %v1520_v12 = vpop.f32.mrb[6].mxu1 }
 0x3c6   : > { %v1524_v14 = vmul.f32 0.35355338, %v1520_v12  ;;  %v3998_v15 = vpop.f32.mrb[7].mxu1  ;;  %v1186_v12 = vld [vmem:[%s4649_s30] sm:$0xff] }
 0x3c7   : > { %v1188_v15 = vld [vmem:[%s4649_s30 + $0x10] sm:$0xff] }
 0x3c8   : > { %v1531_v16 = vadd.f32 %v3779_v13, %v1524_v14 }
 0x3ca   : > { %v1532_v17 = vsel %vm1447_vm2, %v1531_v16, -inf }
 0x3cb   : > { %1533 = vmax.xlane.f32.xlu1 %v1532_v17 }
 0x438   : > { %v1690_v18 = vpop.f32.mrb[4].mxu0 }
 0x439   : > { %v1694_v19 = vmul.f32 0.35355338, %v1690_v18  ;;  %v4008_v20 = vpop.f32.mrb[5].mxu0 }
 0x43b   : > { %v1695_v21 = vadd.f32 %v3779_v13, %v1694_v19 }
 0x43c   : > { %v1858_v22 = vpop.f32.mrb[6].mxu0 }
 0x43d   : > { %v1862_v23 = vmul.f32 0.35355338, %v1858_v22  ;;  %v4018_v24 = vpop.f32.mrb[7].mxu0  ;;  %v1696_v25 = vsel %vm1447_vm2, %v1695_v21, -inf }
 0x43e   : > { %1697 = vmax.xlane.f32.xlu0 %v1696_v25 }
 0x43f   : > { %v1863_v26 = vadd.f32 %v3779_v13, %v1862_v23 }
 0x440   : > { %v2025_v27 = vpop.f32.mrb[8].mxu0 }
 0x441   : > { %v2029_v28 = vmul.f32 0.35355338, %v2025_v27  ;;  %v4028_v29 = vpop.f32.mrb[9].mxu0  ;;  %v1864_v30 = vsel %vm1447_vm2, %v1863_v26, -inf }
 0x442   : > { %1865 = vmax.xlane.f32.xlu0 %v1864_v30  ;;  %v3790_v30 = vld [vmem:[%s5212_s6] ss:$0 sm:$0xff] }
 0x443   : > { %v2030_v31 = vadd.f32 %v3779_v13, %v2029_v28  ;;  %v1187_v13 = vld [vmem:[%s4649_s30 + $0x8] sm:$0xff] }
 0x444   : > { %v4206_v14 = vpack.c.bf16 %v1187_v13, %v1186_v12 }
 0x445   : > { %v2031_v32 = vsel %vm1447_vm2, %v2030_v31, -inf }
 0x446   : > { %2032 = vmax.xlane.f32.xlu1 %v2031_v32  ;;  %4207 = vmatpush3.bf16.msra.mxu0 %v4206_v14 }
 0x447   : > { %4208 = vmatprep.subr.bf16.mxu0 %v4569_v3 }
 0x458   : > { %v1534_v33 = vpop.xlane.xlu1 %1533  ;;  %1371 = vrot.lane.b32.xlu0 %v4829_v44, %s5210_s3 }
 0x459   : > { %v1535_v34 = vsub.f32 %v1531_v16, %v1534_v33  ;;  %v1189_v16 = vld [vmem:[%s4649_s30 + $0x18] sm:$0xff] }
 0x45a   : > { %v4209_v17 = vpack.c.bf16 %v1189_v16, %v1188_v15 }
 0x45b   : > { %v1536_v35 = vmul.f32 1.442695, %v1535_v34 }
 0x45c   : > { %4210 = vmatpush3.bf16.msra.mxu0 %v4209_v17 }
 0x45d   : > { %4436 = vpow2.f32 %v1536_v35 }
 0x467   : > { %v4437_v36 = vpop.eup %4436 }
 0x468   : > { %v1538_v37 = vsel %vm1447_vm2, %v4437_v36, 0.0 }
 0x469   : > { %1539 = vadd.xlane.f32.xlu1 %v1538_v37  ;;  %v2249_v37 = vld [vmem:[%s5203_s12 + $0x8] sm:$0xff] }
 0x4cb   : > { %v1698_v38 = vpop.xlane.xlu0 %1697 }
 0x4cc   : > { %v1699_v39 = vsub.f32 %v1695_v21, %v1698_v38 }
 0x4ce   : > { %v1700_v40 = vmul.f32 1.442695, %v1699_v39 }
 0x4cf   : > { %v1866_v41 = vpop.xlane.xlu0 %1865 }
 0x4d0   : > { %4438 = vpow2.f32 %v1700_v40  ;;  %v1867_v42 = vsub.f32 %v1863_v26, %v1866_v41 }
 0x4d2   : > { %v1868_v43 = vmul.f32 1.442695, %v1867_v42 }
 0x4d3   : > { %v1372_v45 = vpop.permute.xlu0 %1371  ;;  %v2033_v47 = vpop.xlane.xlu1 %2032 }
 0x4d4   : > { %4440 = vpow2.f32 %v1868_v43  ;;  %v1444_v49 = vadd.f32 %v4868_v2, %v1372_v45  ;;  %v2034_v44 = vsub.f32 %v2030_v31, %v2033_v47  ;;  %v2250_v45 = vld [vmem:[%s5203_s12 + $0x10] sm:$0xff] }
 0x4d6   : > { %v2035_v50 = vmul.f32 1.442695, %v2034_v44  ;;  %1875 = vrot.lane.b32.xlu0 %v1444_v49, %s5173_s23  ;;  %4000 = vmatpush3.msra.mxu1 %v1444_v49  ;;  %s5178_s23 = smov 16  }
 0x4d7   : > { %4009 = vmatprep.subr.mxu1 %v4571_v6 }
 0x4d8   : > { %4442 = vpow2.f32 %v2035_v50 }
 0x4da   : > { %v4439_v51 = vpop.eup %4438  ;;  %2042 = vrot.lane.b32.xlu0 %v1444_v49, %s5171_s22  ;;  %s5177_s22 = smov 8  }
 0x4db   : > { %v1702_v52 = vsel %vm1447_vm2, %v4439_v51, 0.0 }
 0x4dc   : > { %1703 = vadd.xlane.f32.xlu1 %v1702_v52 }
 0x4de   : > { %v4441_v53 = vpop.eup %4440 }
 0x4df   : > { %v1870_v54 = vsel %vm1447_vm2, %v4441_v53, 0.0 }
 0x4e0   : > { %1871 = vadd.xlane.f32.xlu1 %v1870_v54 }
 0x4e2   : > { %v4443_v55 = vpop.eup %4442 }
 0x4e3   : > { %v2037_v56 = vsel %vm1447_vm2, %v4443_v55, 0.0 }
 0x4e4   : > { %2038 = vadd.xlane.f32.xlu1 %v2037_v56 }
 0x4f5   : > { %1708 = vrot.lane.b32.xlu1 %v1444_v49, %s5211_s5 }
 0x4f6   : > { %v1540_v57 = vpop.xlane.xlu1 %1539 }
 0x4f7   : > { %4444 = vrcp.f32 %v1540_v57 }
 0x501   : > { %v4445_v58 = vpop.eup %4444 }
 0x502   : > { %v1542_v59 = vmul.f32 %v4445_v58, %v4437_v36  ;;  %v2248_v36 = vld [vmem:[%s5203_s12] sm:$0xff] }
 0x503   : > { %v4384_v38 = vpack.i.bf16 %v2249_v37, %v2248_v36 }
 0x504   : > { %4002 = vmatmul.mubr.msk.f32.vlgmr.msra.gmra.mrb[8].mxu1 %vm1447_vm2, %v1542_v59 }
 0x505   : > { %4011 = vmatprep.mubr.msk.f32.mxu1 %vm4570_vm0, %v4571_v6 }
 0x548   : > { %v1876_v0 = vpop.permute.xlu0 %1875 }
 0x54c   : > { %v2043_v7 = vpop.permute.xlu0 %2042 }
 0x569   : > { %v1704_v60 = vpop.xlane.xlu1 %1703 }
 0x56a   : > { %4446 = vrcp.f32 %v1704_v60 }
 0x56d   : > { %v1872_v61 = vpop.xlane.xlu1 %1871 }
 0x56e   : > { %4448 = vrcp.f32 %v1872_v61 }
 0x571   : > { %v2039_v62 = vpop.xlane.xlu1 %2038 }
 0x572   : > { %4450 = vrcp.f32 %v2039_v62 }
 0x574   : > { %v4447_v63 = vpop.eup %4446 }
 0x575   : > { %v1706_v1 = vmul.f32 %v4447_v63, %v4439_v51  ;;  %v1709_v2 = vpop.permute.xlu1 %1708 }
 0x576   : > { %4010 = vmatpush3.msra.mxu1 %v1709_v2 }
 0x577   : > { %4012 = vmatmul.mubr.msk.f32.vlgmr.msra.gmra.mrb[10].mxu1 %vm1447_vm2, %v1706_v1  ;;  %4019 = vmatprep.subr.mxu1 %v4571_v6 }
 0x578   : > { %v4449_v4 = vpop.eup %4448  ;;  %4020 = vmatpush3.msra.mxu1 %v1876_v0  ;;  %4021 = vmatprep.mubr.msk.f32.mxu1 %vm4570_vm0, %v4571_v6 }
 0x579   : > { %v1874_v5 = vmul.f32 %v4449_v4, %v4441_v53  ;;  %4029 = vmatprep.subr.mxu1 %v4571_v6 }
 0x57b   : > { %4022 = vmatmul.mubr.msk.f32.vlgmr.msra.gmra.mrb[12].mxu1 %vm1447_vm2, %v1874_v5 }
 0x57c   : > { %v4451_v8 = vpop.eup %4450  ;;  %4030 = vmatpush3.msra.mxu1 %v2043_v7  ;;  %4031 = vmatprep.mubr.msk.f32.mxu1 %vm4570_vm0, %v4571_v6 }
 0x57d   : > { %v2041_v9 = vmul.f32 %v4451_v8, %v4443_v55  ;;  %4211 = vmatprep.subr.bf16.mxu1 %v4569_v3  ;;  %v4212_v55 = vpack.c.bf16 %v2249_v37, %v2248_v36 }
 0x57f   : > { %4032 = vmatmul.mubr.msk.f32.vlgmr.msra.gmra.mrb[14].mxu1 %vm1447_vm2, %v2041_v9 }
 0x580   : > { %4053 = vmatprep.mubr.msk.f32.mxu1 %vm4570_vm0, %v4571_v6  ;;  %4213 = vmatpush3.bf16.msra.mxu1 %v4212_v55 }
 0x581   : > { %4214 = vmatprep.subr.bf16.mxu1 %v4569_v3 }
 0x5d7   : > { %v1612_v10 = vpop.f32.mrb[8].mxu1 }
 0x5d8   : > { %v4003_v11 = vpop.f32.mrb[9].mxu1 }
 0x64a   : > { %v1780_v18 = vpop.f32.mrb[10].mxu1 }
 0x64b   : > { %2119 = vrot.lane.b32.xlu0 %v1780_v18, %s5177_s22  ;;  %v4013_v19 = vpop.f32.mrb[11].mxu1  ;;  %s5216_s22 = sld [smem:[#allocation14_spill]] }
 0x64e   : > { %v1947_v20 = vpop.f32.mrb[12].mxu1 }
 0x64f   : > { %2123 = vrot.lane.b32.xlu0 %v1947_v20, %s5178_s23  ;;  %v4023_v21 = vpop.f32.mrb[13].mxu1  ;;  %s3831_s23 = sshll.u32 %s4796_s2, 4 }
 0x650   : > { %s974_s6 = scalar_lea.vmem %s5214_s9, %s3831_s23  ;;  %s979_s14 = scalar_lea.vmem %s5215_s13, %s3831_s23 }
 0x651   : > { %v995_v52 = vld [vmem:[%s974_s6] sm:$0xff]  ;;  %s5217_s9 = sld [smem:[#allocation21_spill]]  ;;  %s5218_s23 = sld [smem:[#allocation22_spill]]  ;;  %v996_v0 = vld [vmem:[%s974_s6 + $0x8] sm:$0xff] }
 0x652   : > { %v2114_v22 = vpop.f32.mrb[14].mxu1  ;;  %v997_v53 = vld [vmem:[%s979_s14] sm:$0xff]  ;;  %v998_v1 = vld [vmem:[%s979_s14 + $0x8] sm:$0xff]  ;;  %s5222_s14 = smov 112   ;;  %s5224_s6 = smov 16  }
 0x653   : > { %2127 = vrot.lane.b32.xlu1 %v2114_v22, %s5176_s8  ;;  %v4033_v23 = vpop.f32.mrb[15].mxu1  ;;  %s5213_s8 = smov 96   ;;  %v2246_v54 = vadd.f32 %v997_v53, %v995_v52  ;;  %v4945_v57 = vld [vmem:[%s5216_s22] ss:$0 sm:$0xff]  ;;  %v2247_v4 = vadd.f32 %v998_v1, %v996_v0  ;;  %s5226_s22 = smov 8  }
 0x657   : > { %v3792_v7 = vld [vmem:[%s5217_s9] ss:$0 sm:$0xff]  ;;  %s5221_s9 = sld [smem:[#allocation8_spill]] }
 0x658   : > { %v3793_v9 = vld [vmem:[%s5218_s23] ss:$0 sm:$0xff] }
 0x6bd   : > { %v2120_v24 = vpop.permute.xlu0 %2119 }
 0x6be   : > { %v2130_v26 = vsel %vm1447_vm2, %v1612_v10, %v2120_v24 }
 0x6c1   : > { %v2124_v25 = vpop.permute.xlu0 %2123 }
 0x6c2   : > { %v2132_v27 = vsel %vm2131_vm3, %v2130_v26, %v2124_v25 }
 0x6c5   : > { %v2128_v28 = vpop.permute.xlu1 %2127 }
 0x6c6   : > { %v2134_v29 = vsel %vm2133_vm4, %v2132_v27, %v2128_v28 }
 0x6c7   : > { %4043 = vmatmul.mubr.msk.f32.vlgmr.msra.gmra.mrb[10].mxu0 %vm1013_vm1, %v2134_v29 }
 0x6c8   : > { %4064 = vmatprep.mubr.msk.f32.mxu0 %vm1013_vm1, %v2246_v54 }
 0x79a   : > { %v2210_v31 = vpop.f32.mrb[10].mxu0 }
 0x79b   : > { %v2211_v32 = vadd.f32 %v3790_v30, %v2210_v31  ;;  %v4044_v33 = vpop.f32.mrb[11].mxu0 }
 0x79d   : > { %v2214_v34 = vadd.f32 %v2211_v32, %v4838_v46  ;;  %v2251_v46 = vld [vmem:[%s5203_s12 + $0x18] sm:$0xff] }
 0x79e   : > { %v4389_v47 = vpack.i.bf16 %v2251_v46, %v2250_v45  ;;  %v4215_v56 = vpack.c.bf16 %v2251_v46, %v2250_v45 }
 0x79f   : > { %v2217_v35 = vsel %vm1013_vm1, %v2214_v34, 0.0 }
 0x7a0   : > { %2218 = vadd.xlane.f32.xlu0 %v2217_v35  ;;  %4216 = vmatpush3.bf16.msra.mxu1 %v4215_v56 }
 0x7b6   : > { %4385 = vrot.lane.b32.xlu0 %v4384_v38, %s5213_s8 }
 0x7ba   : > { %2353 = vrot.lane.b32.xlu0 %v4945_v57, %s5213_s8 }
 0x7be   : > { %4400 = vrot.lane.b32.xlu0 %v4389_v47, %s5210_s3 }
 0x82d   : > { %v2219_v39 = vpop.xlane.xlu0 %2218 }
 0x82e   : > { %v2221_v40 = vmul.f32 0.03125, %v2219_v39 }
 0x830   : > { %v2222_v41 = vsub.f32 %v2214_v34, %v2221_v40 }
 0x831   : > { %v4386_v49 = vpop.permute.xlu0 %4385 }
 0x832   : > { %v2223_v42 = vmul.f32 %v2222_v41, %v2222_v41  ;;  %v4388_v44 = vunpack.i.h.bf16 %v4386_v49  ;;  %v4387_v50 = vunpack.i.l.bf16 %v4386_v49 }
 0x834   : > { %v2224_v43 = vsel %vm1013_vm1, %v2223_v42, 0.0  ;;  %v4217_v51 = vpack.c.bf16 %v4388_v44, %v4387_v50 }
 0x835   : > { %2225 = vadd.xlane.f32.xlu1 %v2224_v43  ;;  %v2354_v13 = vpop.permute.xlu0 %2353 }
 0x836   : > { %4218 = vmatprep.subr.bf16.mxu0 %v4217_v51 }
 0x837   : > { %4220 = vmatpush3.bf16.msra.mxu0 %v4217_v51 }
 0x839   : > { %v4401_v24 = vpop.permute.xlu0 %4400 }
 0x83a   : > { %v4403_v27 = vunpack.i.h.bf16 %v4401_v24  ;;  %v4402_v28 = vunpack.i.l.bf16 %v4401_v24 }
 0x83c   : > { %v4229_v30 = vpack.c.bf16 %v4403_v27, %v4402_v28 }
 0x846   : > { %4390 = vrot.lane.b32.xlu1 %v4389_v47, %s5213_s8  ;;  %s989_s8 = scalar_lea.vmem %s5221_s9, %s4796_s2  ;;  %s5225_s2 = sld [smem:[#allocation15_spill]] }
 0x847   : > { %v4987_v32 = vld [vmem:[%s989_s8] ss:$0 sm:$0xff]  ;;  %s5227_s8 = sld [smem:[#allocation16_spill]] }
 0x84a   : > { %4395 = vrot.lane.b32.xlu1 %v4384_v38, %s5210_s3 }
 0x8c2   : > { %v2226_v58 = vpop.xlane.xlu1 %2225 }
 0x8c3   : > { %v2227_v59 = vmul.f32 0.03125, %v2226_v58 }
 0x8c5   : > { %v2228_v60 = vadd.f32 1e-05, %v2227_v59 }
 0x8c6   : > { %v4391_v61 = vpop.permute.xlu1 %4390 }
 0x8c7   : > { %4452 = vrsqrt.f32 %v2228_v60  ;;  %v4393_v62 = vunpack.i.h.bf16 %v4391_v61  ;;  %v4392_v63 = vunpack.i.l.bf16 %v4391_v61 }
 0x8c9   : > { %v4221_v2 = vpack.c.bf16 %v4393_v62, %v4392_v63 }
 0x8ca   : > { %v4396_v23 = vpop.permute.xlu1 %4395 }
 0x8cb   : > { %4222 = vmatprep.subr.bf16.mxu0 %v4221_v2  ;;  %v4398_v25 = vunpack.i.h.bf16 %v4396_v23  ;;  %v4397_v26 = vunpack.i.l.bf16 %v4396_v23 }
 0x8cc   : > { %4224 = vmatpush3.bf16.msra.mxu0 %v4221_v2 }
 0x8cd   : > { %4233 = vmatprep.subr.bf16.mxu0 %v4569_v3  ;;  %v4225_v29 = vpack.c.bf16 %v4398_v25, %v4397_v26 }
 0x8cf   : > { %4065 = vmatmul.mubr.msk.f32.vlgmr.msra.gmra.mrb[12].mxu0 %vm1013_vm1, %v2247_v4  ;;  %4226 = vmatprep.subr.bf16.mxu1 %v4225_v29 }
 0x8d0   : > { %4082 = vmatprep.mubr.msk.f32.mxu0 %vm4570_vm0, %v4571_v6 }
 0x8d1   : > { %v4453_v5 = vpop.eup %4452 }
 0x8d2   : > { %v2230_v8 = vmul.f32 %v4453_v5, %v2222_v41 }
 0x8d4   : > { %v2237_v10 = vmul.f32 %v3792_v7, %v2230_v8 }
 0x8d6   : > { %v4955_v11 = vadd.f32 %v3793_v9, %v2237_v10 }
 0x8d8   : > { %v2245_v12 = vadd.f32 %v4955_v11, %v4840_v48 }
 0x8da   : > { %4054 = vmatmul.mubr.msk.f32.vlgmr.msra.gmra.mrb[16].mxu1 %vm1013_vm1, %v2245_v12 }
 0x8db   : > { %4075 = vmatprep.mubr.msk.f32.mxu1 %vm1013_vm1, %v995_v52  ;;  %4228 = vmatpush3.bf16.msra.mxu1 %v4225_v29 }
 0x8dc   : > { %4230 = vmatprep.subr.bf16.mxu1 %v4229_v30 }
 0x8df   : > { %4232 = vmatpush3.bf16.msra.mxu1 %v4229_v30 }
 0x8e0   : > { %4237 = vmatprep.subr.bf16.mxu1 %v4569_v3 }
 0x8e2   : > { %4076 = vmatmul.mubr.msk.f32.vlgmr.msra.gmra.mrb[18].mxu1 %vm1013_vm1, %v996_v0 }
 0x8e3   : > { %4089 = vmatprep.mubr.msk.f32.mxu1 %vm4570_vm0, %v4571_v6 }
 0x9a2   : > { %v4066_v14 = vpop.f32.mrb[12].mxu0 }
 0x9a3   : > { %v2434_v15 = vadd.f32 %v4066_v14, %v2354_v13  ;;  %v2428_v16 = vpop.f32.mrb[13].mxu0 }
 0x9a4   : > { %v2429_v17 = vadd.f32 %v2428_v16, %v2354_v13 }
 0x9a6   : > { %v4234_v48 = vpack.c.bf16 %v2434_v15, %v2429_v17  ;;  %v4969_v19 = vpack.i.bf16 %v2434_v15, %v2429_v17 }
 0x9a8   : > { %4236 = vmatpush3.bf16.xpose.msk.msra.mxu0 %vm4965_vm5, %v4234_v48 }
 0x9a9   : > { %4244 = vmatprep.subr.bf16.mxu0 %v4569_v3 }
 0x9ad   : > { %v2333_v20 = vpop.f32.mrb[16].mxu1 }
 0x9ae   : > { %v4975_v21 = vadd.f32 %v4945_v57, %v2333_v20  ;;  %v4055_v22 = vpop.f32.mrb[17].mxu1 }
 0x9b0   : > { %4083 = vmatmul.mubr.msk.f32.vlgmr.msra.gmra.mrb[14].mxu0 %vm1447_vm2, %v4975_v21 }
 0x9b1   : > { %4103 = vmatprep.mubr.msk.f32.mxu0 %vm4570_vm0, %v4571_v6 }
 0x9b5   : > { %v4077_v42 = vpop.f32.mrb[18].mxu1 }
 0x9b6   : > { %v2524_v43 = vpop.f32.mrb[19].mxu1 }
 0xa83   : > { %v2608_v31 = vpop.f32.mrb[14].mxu0 }
 0xa84   : > { %v2612_v33 = vmul.f32 0.35355338, %v2608_v31  ;;  %v4084_v34 = vpop.f32.mrb[15].mxu0 }
 0xa86   : > { %v2619_v35 = vadd.f32 %v4987_v32, %v2612_v33 }
 0xa88   : > { %v2620_v36 = vsel %vm2131_vm3, %v2619_v35, -inf }
 0xa89   : > { %2621 = vmax.xlane.f32.xlu1 %v2620_v36 }
 0xa9a   : > { %4405 = vrot.lane.b32.xlu1 %v4969_v19, %s5211_s5 }
 0xa9e   : > { %2704 = vrot.lane.b32.xlu1 %v4975_v21, %s5211_s5 }
 0xb16   : > { %v2622_v37 = vpop.xlane.xlu1 %2621 }
 0xb17   : > { %v2623_v38 = vsub.f32 %v2619_v35, %v2622_v37 }
 0xb19   : > { %v2624_v39 = vmul.f32 1.442695, %v2623_v38 }
 0xb1a   : > { %v4406_v51 = vpop.permute.xlu1 %4405 }
 0xb1b   : > { %4454 = vpow2.f32 %v2624_v39  ;;  %v4408_v53 = vunpack.i.h.bf16 %v4406_v51  ;;  %v4407_v54 = vunpack.i.l.bf16 %v4406_v51 }
 0xb1d   : > { %v4241_v56 = vpack.c.bf16 %v4408_v53, %v4407_v54 }
 0xb25   : > { %v4455_v40 = vpop.eup %4454 }
 0xb26   : > { %v2626_v41 = vsel %vm2131_vm3, %v4455_v40, 0.0 }
 0xb27   : > { %2627 = vadd.xlane.f32.xlu0 %v2626_v41 }
 0xb3d   : > { %2449 = vrot.lane.b32.xlu0 %v4945_v57, %s5210_s3  ;;  %v2705_v57 = vpop.permute.xlu1 %2704  ;;  %s963_s3 = sand.u32 1, %s4530_s10  }
 0xb3e   : > { %s5068_s23 = sshll.u32 %s963_s3, 3 }
 0xb3f   : > { %s965_s9 = scalar_lea.vmem [#allocation2], %s5068_s23 }
 0xbb4   : > { %v2628_v45 = vpop.xlane.xlu0 %2627 }
 0xbb5   : > { %4456 = vrcp.f32 %v2628_v45 }
 0xbb8   : > { %v2450_v46 = vpop.permute.xlu0 %2449 }
 0xbb9   : > { %v2525_v47 = vadd.f32 %v2524_v43, %v2450_v46  ;;  %v2530_v49 = vadd.f32 %v4077_v42, %v2450_v46 }
 0xbbb   : > { %v4238_v44 = vpack.c.bf16 %v2530_v49, %v2525_v47  ;;  %v4998_v50 = vpack.i.bf16 %v2530_v49, %v2525_v47 }
 0xbbd   : > { %4239 = vmatpush3.bf16.msra.mxu1 %v4238_v44 }
 0xbbe   : > { %4240 = vmatprep.subr.bf16.mxu1 %v4569_v3 }
 0xbbf   : > { %v4457_v52 = vpop.eup %4456 }
 0xbc0   : > { %v5001_v55 = vmul.f32 %v4457_v52, %v4455_v40 }
 0xbc2   : > { %4090 = vmatmul.mubr.msk.f32.vlgmr.msra.gmra.mrb[20].mxu1 %vm2131_vm3, %v5001_v55 }
 0xbc3   : > { %4096 = vmatprep.mubr.msk.f32.mxu1 %vm4570_vm0, %v4571_v6 }
 0xbc6   : > { %4243 = vmatpush3.bf16.xpose.msk.msra.mxu1 %vm4965_vm5, %v4241_v56 }
 0xbc7   : > { %4251 = vmatprep.subr.bf16.mxu1 %v4569_v3 }
 0xbcd   : > { %4097 = vmatmul.mubr.msk.f32.vlgmr.msra.gmra.mrb[22].mxu1 %vm1447_vm2, %v2705_v57 }
 0xbce   : > { %4117 = vmatprep.mubr.msk.f32.mxu1 %vm4570_vm0, %v4571_v6 }
 0xc95   : > { %v5013_v58 = vpop.f32.mrb[20].mxu1 }
 0xc96   : > { %v4091_v59 = vpop.f32.mrb[21].mxu1 }
 0xca0   : > { %v2782_v60 = vpop.f32.mrb[22].mxu1 }
 0xca1   : > { %v2786_v61 = vmul.f32 0.35355338, %v2782_v60  ;;  %v4098_v62 = vpop.f32.mrb[23].mxu1 }
 0xca3   : > { %v2787_v63 = vadd.f32 %v4987_v32, %v2786_v61 }
 0xca5   : > { %v2788_v0 = vsel %vm2131_vm3, %v2787_v63, -inf }
 0xca6   : > { %2789 = vmax.xlane.f32.xlu0 %v2788_v0 }
 0xcbc   : > { %4410 = vrot.lane.b32.xlu0 %v4998_v50, %s5211_s5  ;;  %s5223_s5 = smov 104  }
 0xcc0   : > { %2881 = vrot.lane.b32.xlu0 %v4975_v21, %s5222_s14 }
 0xd33   : > { %v2790_v1 = vpop.xlane.xlu0 %2789 }
 0xd34   : > { %v2791_v2 = vsub.f32 %v2787_v63, %v2790_v1 }
 0xd36   : > { %v2792_v4 = vmul.f32 1.442695, %v2791_v2 }
 0xd37   : > { %v4411_v5 = vpop.permute.xlu0 %4410 }
 0xd38   : > { %4458 = vpow2.f32 %v2792_v4  ;;  %v4413_v7 = vunpack.i.h.bf16 %v4411_v5  ;;  %v4412_v8 = vunpack.i.l.bf16 %v4411_v5 }
 0xd3a   : > { %v4245_v9 = vpack.c.bf16 %v4413_v7, %v4412_v8  ;;  %v2253_v7 = vld [vmem:[%s5225_s2] sm:$0xff]  ;;  %v2254_v8 = vld [vmem:[%s5225_s2 + $0x8] sm:$0xff] }
 0xd3b   : > { %v2882_v22 = vpop.permute.xlu0 %2881 }
 0xd3c   : > { %4246 = vmatpush3.bf16.msra.mxu0 %v4245_v9  ;;  %v2255_v9 = vld [vmem:[%s5225_s2 + $0x10] sm:$0xff] }
 0xd3d   : > { %4247 = vmatprep.subr.bf16.mxu0 %v4569_v3 }
 0xd42   : > { %v4459_v10 = vpop.eup %4458 }
 0xd43   : > { %v2794_v12 = vsel %vm2131_vm3, %v4459_v10, 0.0 }
 0xd44   : > { %2795 = vadd.xlane.f32.xlu1 %v2794_v12  ;;  %v2256_v12 = vld [vmem:[%s5225_s2 + $0x18] sm:$0xff]  ;;  %s3575_s2 = scalar_lea.sflag [#allocation3], %s963_s3 }
 0xd55   : > { %4415 = vrot.lane.b32.xlu1 %v4969_v19, %s5222_s14 }
 0xdd1   : > { %v2796_v13 = vpop.xlane.xlu1 %2795 }
 0xdd2   : > { %4460 = vrcp.f32 %v2796_v13  ;;  %v4265_v13 = vpack.c.bf16 %v2256_v12, %v2255_v9 }
 0xdd5   : > { %v4416_v14 = vpop.permute.xlu1 %4415 }
 0xdd6   : > { %v4418_v15 = vunpack.i.h.bf16 %v4416_v14  ;;  %v4417_v16 = vunpack.i.l.bf16 %v4416_v14 }
 0xdd8   : > { %v4248_v20 = vpack.c.bf16 %v4418_v15, %v4417_v16 }
 0xddc   : > { %v4461_v17 = vpop.eup %4460 }
 0xddd   : > { %v2798_v48 = vmul.f32 %v4461_v17, %v4459_v10  ;;  %v4262_v10 = vpack.c.bf16 %v2254_v8, %v2253_v7 }
 0xddf   : > { %4104 = vmatmul.mubr.msk.f32.vlgmr.msra.gmra.mrb[16].mxu0 %vm2131_vm3, %v2798_v48  ;;  %v2880_v45 = vadd.f32 %v2798_v48, %v5001_v55 }
 0xde0   : > { %4250 = vmatpush3.bf16.xpose.msk.msra.mxu0 %vm4965_vm5, %v4248_v20  ;;  %4110 = vmatprep.mubr.msk.f32.mxu0 %vm4570_vm0, %v4571_v6 }
 0xde1   : > { %4258 = vmatprep.subr.bf16.mxu0 %v4569_v3 }
 0xde7   : > { %4111 = vmatmul.mubr.msk.f32.vlgmr.msra.gmra.mrb[18].mxu0 %vm1447_vm2, %v2882_v22 }
 0xde8   : > { %4131 = vmatprep.mubr.msk.f32.mxu0 %vm4570_vm0, %v4571_v6 }
 0xeb2   : > { %v5034_v23 = vpop.f32.mrb[16].mxu0 }
 0xeb3   : > { %v4105_v24 = vpop.f32.mrb[17].mxu0 }
 0xeb4   : > { %v3817_v24 = vld [vmem:[%s5227_s8] ss:$0 sm:$0xff]  ;;  %s5232_s8 = sld [smem:[#allocation19_spill]] }
 0xeba   : > { %v2959_v25 = vpop.f32.mrb[18].mxu0 }
 0xebb   : > { %v2963_v26 = vmul.f32 0.35355338, %v2959_v25  ;;  %v4112_v27 = vpop.f32.mrb[19].mxu0 }
 0xebd   : > { %v2964_v28 = vadd.f32 %v4987_v32, %v2963_v26 }
 0xebf   : > { %v2965_v29 = vsel %vm2131_vm3, %v2964_v28, -inf }
 0xec0   : > { %2966 = vmax.xlane.f32.xlu1 %v2965_v29 }
 0xed1   : > { %4425 = vrot.lane.b32.xlu1 %v4969_v19, %s5223_s5 }
 0xed5   : > { %3056 = vrot.lane.b32.xlu1 %v4975_v21, %s5223_s5 }
 0xf4d   : > { %v2967_v30 = vpop.xlane.xlu1 %2966 }
 0xf4e   : > { %v2968_v31 = vsub.f32 %v2964_v28, %v2967_v30 }
 0xf50   : > { %v2969_v33 = vmul.f32 1.442695, %v2968_v31 }
 0xf51   : > { %v4426_v40 = vpop.permute.xlu1 %4425 }
 0xf52   : > { %4462 = vpow2.f32 %v2969_v33  ;;  %v4428_v41 = vunpack.i.h.bf16 %v4426_v40  ;;  %v4427_v42 = vunpack.i.l.bf16 %v4426_v40 }
 0xf54   : > { %v4255_v47 = vpack.c.bf16 %v4428_v41, %v4427_v42 }
 0xf55   : > { %v3057_v49 = vpop.permute.xlu1 %3056 }
 0xf5c   : > { %v4463_v34 = vpop.eup %4462 }
 0xf5d   : > { %v2971_v35 = vsel %vm2131_vm3, %v4463_v34, 0.0 }
 0xf5e   : > { %2972 = vadd.xlane.f32.xlu0 %v2971_v35 }
 0xf74   : > { %4420 = vrot.lane.b32.xlu0 %v4998_v50, %s5222_s14  ;;  %s5228_s14 = smov 24  }
 0xfeb   : > { %v2973_v36 = vpop.xlane.xlu0 %2972 }
 0xfec   : > { %4464 = vrcp.f32 %v2973_v36 }
 0xfef   : > { %v4421_v37 = vpop.permute.xlu0 %4420 }
 0xff0   : > { %v4423_v38 = vunpack.i.h.bf16 %v4421_v37  ;;  %v4422_v39 = vunpack.i.l.bf16 %v4421_v37 }
 0xff2   : > { %v4252_v19 = vpack.c.bf16 %v4423_v38, %v4422_v39 }
 0xff4   : > { %4253 = vmatpush3.bf16.msra.mxu1 %v4252_v19 }
 0xff5   : > { %4254 = vmatprep.subr.bf16.mxu1 %v4569_v3 }
 0xff6   : > { %v4465_v21 = vpop.eup %4464 }
 0xff7   : > { %v2975_v43 = vmul.f32 %v4465_v21, %v4463_v34 }
 0xff9   : > { %4118 = vmatmul.mubr.msk.f32.vlgmr.msra.gmra.mrb[24].mxu1 %vm2131_vm3, %v2975_v43  ;;  %v3055_v46 = vadd.f32 %v2975_v43, %v2880_v45 }
 0xffa   : > { %4124 = vmatprep.mubr.msk.f32.mxu1 %vm4570_vm0, %v4571_v6 }
 0xffd   : > { %4257 = vmatpush3.bf16.xpose.msk.msra.mxu1 %vm4965_vm5, %v4255_v47  ;;  %v3449_v47 = vld [vmem:[%s5232_s8] sm:$0xff] }
 0xffe   : > { %4267 = vmatprep.subr.bf16.mxu1 %v4569_v3 }
0x1004   : > { %4125 = vmatmul.mubr.msk.f32.vlgmr.msra.gmra.mrb[26].mxu1 %vm1447_vm2, %v3057_v49  ;;  %v3450_v49 = vld [vmem:[%s5232_s8 + $0x8] sm:$0xff] }
0x1005   : > { %4153 = vmatprep.mubr.msk.f32.mxu1 %vm4570_vm0, %v4571_v6 }
0x10cc   : > { %v3051_v44 = vpop.f32.mrb[24].mxu1 }
0x10cd   : > { %v4119_v51 = vpop.f32.mrb[25].mxu1 }
0x10ce   : > { %v3451_v51 = vld [vmem:[%s5232_s8 + $0x10] sm:$0xff] }
0x10d7   : > { %v3134_v52 = vpop.f32.mrb[26].mxu1 }
0x10d8   : > { %v3138_v53 = vmul.f32 0.35355338, %v3134_v52  ;;  %v4126_v54 = vpop.f32.mrb[27].mxu1  ;;  %v3452_v52 = vld [vmem:[%s5232_s8 + $0x18] sm:$0xff] }
0x10d9   : > { %v3453_v54 = vld [vmem:[%s5232_s8 + $0x20] sm:$0xff] }
0x10da   : > { %v3139_v55 = vadd.f32 %v4987_v32, %v3138_v53  ;;  %v4277_v53 = vpack.c.bf16 %v3452_v52, %v3451_v51 }
0x10dc   : > { %v3140_v56 = vsel %vm2131_vm3, %v3139_v55, -inf }
0x10dd   : > { %3141 = vmax.xlane.f32.xlu0 %v3140_v56 }
0x10f3   : > { %4430 = vrot.lane.b32.xlu0 %v4998_v50, %s5223_s5  ;;  %s5229_s5 = sld [smem:[#allocation17_spill]] }
0x10f7   : > { %3236 = vrot.lane.b32.xlu0 %v3051_v44, %s5224_s6  ;;  %s5230_s6 = sld [smem:[#allocation23_spill]]  ;;  %v4274_v44 = vpack.c.bf16 %v3450_v49, %v3449_v47 }
0x10f9   : > { %v3357_v35 = vld [vmem:[%s5229_s5 + $0x8] sm:$0xff]  ;;  %v3359_v37 = vld [vmem:[%s5229_s5 + $0x18] sm:$0xff] }
0x10fd   : > { %v3819_v41 = vld [vmem:[%s5230_s6] ss:$0 sm:$0xff]  ;;  %s5234_s6 = sld [smem:[#allocation20_spill]] }
0x116a   : > { %v3142_v18 = vpop.xlane.xlu0 %3141 }
0x116b   : > { %v3143_v57 = vsub.f32 %v3139_v55, %v3142_v18  ;;  %v3454_v55 = vld [vmem:[%s5232_s8 + $0x28] sm:$0xff]  ;;  %v3455_v18 = vld [vmem:[%s5232_s8 + $0x30] sm:$0xff] }
0x116c   : > { %v4280_v56 = vpack.c.bf16 %v3454_v55, %v3453_v54 }
0x116d   : > { %v3144_v59 = vmul.f32 1.442695, %v3143_v57  ;;  %v3456_v57 = vld [vmem:[%s5232_s8 + $0x38] sm:$0xff]  ;;  %s4580_s8 = smov [#allocation2]  }
0x116e   : > { %v4431_v60 = vpop.permute.xlu0 %4430  ;;  %s4480_s12 = sshll.u32 %s4580_s8, 4  ;;  %s4481_s12 = int_to_ptr.vmem [resolvable:$false] %s4480_s12 }
0x116f   : > { %4466 = vpow2.f32 %v3144_v59  ;;  %v4433_v61 = vunpack.i.h.bf16 %v4431_v60  ;;  %v4432_v62 = vunpack.i.l.bf16 %v4431_v60  ;;  %v4283_v59 = vpack.c.bf16 %v3456_v57, %v3455_v18  ;;  %s4482_s13 = scalar_lea.vmem %s4481_s12, 256 }
0x1171   : > { %v4259_v63 = vpack.c.bf16 %v4433_v61, %v4432_v62 }
0x1172   : > { %v3237_v48 = vpop.permute.xlu0 %3236 }
0x1173   : > { %4260 = vmatpush3.bf16.msra.mxu0 %v4259_v63 }
0x1174   : > { %4261 = vmatprep.subr.bf16.mxu0 %v4569_v3 }
0x1179   : > { %v4467_v32 = vpop.eup %4466 }
0x117a   : > { %v3146_v0 = vsel %vm2131_vm3, %v4467_v32, 0.0 }
0x117b   : > { %3147 = vadd.xlane.f32.xlu1 %v3146_v0 }
0x118c   : > { %3232 = vrot.lane.b32.xlu1 %v5034_v23, %s5226_s22  ;;  %s5231_s22 = sld [smem:[#allocation24_spill]] }
0x1192   : > { %v3820_v43 = vld [vmem:[%s5231_s22] ss:$0 sm:$0xff]  ;;  %s3828_s22 = sshll.u32 %s4757_s0, 7 }
0x1208   : > { %v3148_v50 = vpop.xlane.xlu1 %3147 }
0x1209   : > { %4468 = vrcp.f32 %v3148_v50 }
0x120c   : > { %v3233_v16 = vpop.permute.xlu1 %3232 }
0x120d   : > { %v3243_v17 = vsel %vm1447_vm2, %v5013_v58, %v3233_v16 }
0x120e   : > { %v3244_v20 = vsel %vm2131_vm3, %v3243_v17, %v3237_v48 }
0x1213   : > { %v4469_v1 = vpop.eup %4468 }
0x1214   : > { %v3150_v2 = vmul.f32 %v4469_v1, %v4467_v32 }
0x1216   : > { %4132 = vmatmul.mubr.msk.f32.vlgmr.msra.gmra.mrb[20].mxu0 %vm2131_vm3, %v3150_v2  ;;  %v3230_v4 = vadd.f32 %v3150_v2, %v3055_v46 }
0x1217   : > { %4142 = vmatprep.mubr.msk.f32.mxu0 %vm4570_vm0, %v4571_v6  ;;  %4263 = vmatpush3.bf16.msra.mxu0 %v4262_v10 }
0x1218   : > { %v3325_v5 = vmul.f32 0.25, %v3230_v4  ;;  %4264 = vmatprep.subr.bf16.mxu0 %v4569_v3 }
0x121a   : > { %3569 = vst.msk [vmem:[%s965_s9] sm:$0xff] %vm2131_vm3, %v3325_v5 }
0x121b   : > { %4266 = vmatpush3.bf16.msra.mxu0 %v4265_v13 }
0x121c   : > { %4273 = vmatprep.subr.bf16.mxu0 %v4569_v3 }
0x12e9   : > { %v3226_v14 = vpop.f32.mrb[20].mxu0 }
0x12ea   : > { %3240 = vrot.lane.b32.xlu1 %v3226_v14, %s5228_s14  ;;  %v4133_v15 = vpop.f32.mrb[21].mxu0  ;;  %s5233_s14 = sld [smem:[#allocation18_spill]] }
0x12f0   : > { %v3821_v60 = vld [vmem:[%s5233_s14] ss:$0 sm:$0xff]  ;;  %s3591_s14 = sshll.u32 %s965_s9, 4  ;;  %s3592_s14 = int_to_ptr.vmem [resolvable:$true] %s3591_s14 }
0x12f1   : > { %p4483_p0 = scmp.lt.s32.totalorder %s3592_s14, %s4481_s12 }
0x135c   : > { %v3241_v22 = vpop.permute.xlu1 %3240 }
0x135d   : > { %v3245_v23 = vsel %vm2133_vm4, %v3244_v20, %v3241_v22 }
0x135e   : > { %4143 = vmatmul.mubr.msk.f32.vlgmr.msra.gmra.mrb[22].mxu0 %vm1013_vm1, %v3245_v23 }
0x135f   : > { %4172 = vmatprep.mubr.msk.f32.mxu0 %vm4570_vm0, %v4571_v6  ;;  %v3356_v6 = vld [vmem:[%s5229_s5] sm:$0xff]  ;;  %4275 = vmatpush3.bf16.msra.mxu0 %v4274_v44 }
0x1360   : > { %v4268_v36 = vpack.c.bf16 %v3357_v35, %v3356_v6  ;;  %4276 = vmatprep.subr.bf16.mxu0 %v4569_v3 }
0x1362   : > { %4269 = vmatpush3.bf16.msra.mxu1 %v4268_v36 }
0x1363   : > { %4270 = vmatprep.subr.bf16.mxu1 %v4569_v3  ;;  %4278 = vmatpush3.bf16.msra.mxu0 %v4277_v53 }
0x1364   : > { %4279 = vmatprep.subr.bf16.mxu0 %v4569_v3 }
0x1367   : > { %4281 = vmatpush3.bf16.msra.mxu0 %v4280_v56 }
0x1368   : > { %4282 = vmatprep.subr.bf16.mxu0 %v4569_v3  ;;  %v3823_v3 = vld [vmem:[%s5234_s6] ss:$0 sm:$0xff]  ;;  %s5122_s6 = scalar_lea.hbm %s4734_s4, %s3828_s22 }
0x136b   : > { %4284 = vmatpush3.bf16.msra.mxu0 %v4283_v59 }
0x1431   : > { %v3321_v25 = vpop.f32.mrb[22].mxu0 }
0x1432   : > { %v3322_v26 = vadd.f32 %v3817_v24, %v3321_v25  ;;  %v4144_v27 = vpop.f32.mrb[23].mxu0 }
0x1434   : > { %v3326_v58 = vadd.f32 %v3322_v26, %v4955_v11  ;;  %v3358_v11 = vld [vmem:[%s5229_s5 + $0x10] sm:$0xff]  ;;  %s4476_s5 = scalar_lea.vmem %s3592_s14, 128 }
0x1435   : > { %v4271_v38 = vpack.c.bf16 %v3359_v37, %v3358_v11  ;;  %p4477_p11 = scmp.ne.s32.totalorder %s3592_s14, %s4476_s5  ;;  %p4484_p1 = scmp.lt.s32.totalorder %s4482_s13, %s4476_s5 }
0x1436   : > { %v3329_v28 = vsel %vm1013_vm1, %v3326_v58, 0.0 }
0x1437   : > { %3330 = vadd.xlane.f32.xlu0 %v3329_v28  ;;  %4272 = vmatpush3.bf16.msra.mxu1 %v4271_v38  ;;  %p4478_p12 = pnand %p4477_p11, %p4774_p5  ;;  %p4485_p2 = por %p4484_p1, %p4483_p0 }
0x1439   : > { %p4479_p13 = pneg %p4478_p12 }
0x143b   : > { %p4486_p3 = pnand %p4485_p2, %p4479_p13 }
0x14c4   : > { %v3331_v29 = vpop.xlane.xlu0 %3330 }
0x14c5   : > { %v3332_v30 = vmul.f32 0.03125, %v3331_v29 }
0x14c7   : > { %v3333_v31 = vsub.f32 %v3326_v58, %v3332_v30 }
0x14c9   : > { %v3334_v33 = vmul.f32 %v3333_v31, %v3333_v31 }
0x14cb   : > { %v3335_v34 = vsel %vm1013_vm1, %v3334_v33, 0.0 }
0x14cc   : > { %3336 = vadd.xlane.f32.xlu1 %v3335_v34 }
0x1559   : > { %v3337_v39 = vpop.xlane.xlu1 %3336 }
0x155a   : > { %v3338_v19 = vmul.f32 0.03125, %v3337_v39 }
0x155c   : > { %v3339_v40 = vadd.f32 1e-05, %v3338_v19 }
0x155e   : > { %4470 = vrsqrt.f32 %v3339_v40 }
0x1568   : > { %v4471_v21 = vpop.eup %4470 }
0x1569   : > { %v3341_v42 = vmul.f32 %v4471_v21, %v3333_v31 }
0x156b   : > { %v3348_v45 = vmul.f32 %v3819_v41, %v3341_v42 }
0x156d   : > { %v3355_v46 = vadd.f32 %v3820_v43, %v3348_v45 }
0x156f   : > { %4154 = vmatmul.mubr.msk.f32.vlgmr.msra.gmra.mrb[28].mxu1 %vm1013_vm1, %v3355_v46 }
0x1642   : > { %v3436_v61 = vpop.f32.mrb[28].mxu1 }
0x1643   : > { %v3437_v62 = vadd.f32 %v3821_v60, %v3436_v61  ;;  %v4155_v63 = vpop.f32.mrb[29].mxu1 }
0x1645   : > { %v3441_v32 = vmul.f32 0.044715, %v3437_v62  ;;  %v3440_v5 = vmul.f32 0.5, %v3437_v62 }
0x1647   : > { %v3442_v0 = vmul.f32 %v3441_v32, %v3437_v62 }
0x1649   : > { %v3443_v50 = vmul.f32 %v3442_v0, %v3437_v62 }
0x164b   : > { %v3444_v1 = vadd.f32 %v3443_v50, %v3437_v62 }
0x164d   : > { %v3445_v2 = vmul.f32 0.7978846, %v3444_v1 }
0x164f   : > { %4472 = vtanh.f32 %v3445_v2 }
0x1659   : > { %v4473_v4 = vpop.eup %4472 }
0x165a   : > { %v3447_v7 = vadd.f32 1.0, %v4473_v4 }
0x165c   : > { %v3448_v8 = vmul.f32 %v3447_v7, %v3440_v5 }
0x165e   : > { %4173 = vmatmul.mubr.msk.f32.vlgmr.msra.gmra.mrb[24].mxu0 %vm3464_vm6, %v3448_v8 }
0x1731   : > { %v3534_v9 = vpop.f32.mrb[24].mxu0 }
0x1732   : > { %v3535_v10 = vadd.f32 %v3823_v3, %v3534_v9  ;;  %v4174_v12 = vpop.f32.mrb[25].mxu0 }
0x1734   : > { %v3538_v13 = vadd.f32 %v3535_v10, %v3355_v46 }
0x1736   : > { %v3541_v14 = vsel %vm1013_vm1, %v3538_v13, 0.0 }
0x1737   : > { %3542 = vadd.xlane.f32.xlu0 %v3541_v14 }
0x17c4   : > { %v3543_v15 = vpop.xlane.xlu0 %3542 }
0x17c5   : > { %v3544_v16 = vmul.f32 0.03125, %v3543_v15 }
0x17c7   : > { %v3545_v17 = vsub.f32 %v3538_v13, %v3544_v16 }
0x17c9   : > { %v3546_v48 = vmul.f32 %v3545_v17, %v3545_v17 }
0x17cb   : > { %v3547_v20 = vsel %vm1013_vm1, %v3546_v48, 0.0 }
0x17cc   : > { %3548 = vadd.xlane.f32.xlu0 %v3547_v20 }
0x17cd   : > { %4489 = shalt.err (!%p4486_p3)
}
0x17ce   : > { %s4490_s0 = scalar_lea.hbm %s5122_s6, 128  ;;  %s4494_s3 = scalar_lea.hbm %s4734_s4, 256 }
0x17cf   : > { %p4491_p4 = scmp.ne.s32.totalorder %s5122_s6, %s4490_s0  ;;  %p4495_p9 = scmp.lt.u32.totalorder %s5122_s6, %s4734_s4 }
0x17d0   : > { %p4496_p10 = scmp.lt.u32.totalorder %s4494_s3, %s4490_s0  ;;  %p4498_p12 = scmp.lt.u32.totalorder %s4490_s0, %s5122_s6 }
0x17d1   : > { %p4492_p7 = pnand %p4491_p4, %p4774_p5 }
0x17d2   : > { %p4497_p11 = por %p4496_p10, %p4495_p9 }
0x17d3   : > { %p4493_p8 = pneg %p4492_p7 }
0x17d4   : > { %p4499_p0 = por %p4498_p12, %p4497_p11 }
0x17d6   : > { %p4500_p13 = pnand %p4499_p0, %p4493_p8 }
0x17d8   : > { %4503 = shalt.err (!%p4500_p13)
}
0x17d9   : > { %4285 = dma.vmem_to_hbm [thread:$0]  (%p4774_p5), %s3592_s14, 128, %s5122_s6, %s3575_s2   ;;  %v3825_v26 = vld [vmem:[%s4719_s25] ss:$0 sm:$0xff] }
0x17da   : > { %v3826_v58 = vld [vmem:[%s4724_s20] ss:$0 sm:$0xff]  ;;  %s993_s13 = scalar_lea.vmem %s4729_s27, %s4800_s16 }
0x1859   : > { %v3549_v22 = vpop.xlane.xlu0 %3548 }
0x185a   : > { %v3550_v23 = vmul.f32 0.03125, %v3549_v22 }
0x185c   : > { %v3551_v24 = vadd.f32 1e-05, %v3550_v23 }
0x185e   : > { %4474 = vrsqrt.f32 %v3551_v24 }
0x1868   : > { %v4475_v25 = vpop.eup %4474 }
0x1869   : > { %v3553_v27 = vmul.f32 %v4475_v25, %v3545_v17 }
0x186b   : > { %v3560_v28 = vmul.f32 %v3825_v26, %v3553_v27 }
0x186d   : > { %v3567_v29 = vadd.f32 %v3826_v58, %v3560_v28 }
0x186f   : > { %3568 = vst.msk [vmem:[%s993_s13] sm:$0xff] %vm1013_vm1, %v3567_v29 }
0x1870 PF: > { %p4291_p1 = scmp.ge.s32.totalorder %s4538_s15, 2  ;;  %s3610_s12 = sand.u32 1, %s4526_s7  }
0x1871   : > { %s3611_s28 = scalar_lea.sflag [#allocation3], %s3610_s12 }
0x1872   : > { %p4288_p5 = pnand %p4291_p1, %p4778_p6 }
0x1874   : > { %4521 = dma.done.wait (!%p4288_p5), %s3611_s28, 128  }
0x1875   : > { %4523 = vsyncadd (!%p4288_p5), %s3611_s28, 4294967168  ;;  %p70_p2 = scmp.ge.s32.totalorder %s4761_s18, 4   ;;  %s5235_s7 = smov %s4530_s10 }
0x1876   : > { %s5236_s10 = smov %s4534_s11  ;;  %s5237_s11 = smov %s4772_s26 }
0x1877   : > { %s5238_s15 = smov %s4761_s18  ;;  %72 = sbr.rel (!%p70_p2) target bundleno = 58 (0x3a), region = 223 }
0x187e   :  { %3616 = vsyncpa [#allocation3], 1 }
0x187f   :  { %3618 = vsyncpa [#allocation3 + $0x1], 1 }

</bundles_post_ra>
